<compile_context>
chip_gen: v5e
topology: v5e:2x2
jax: 0.10.0
libtpu: 0.0.40
codegen_flags: <defaults>
</compile_context>

<pallas_src>
import jax
import jax.numpy as jnp
from jax.experimental import pallas as pl
from jax.experimental.pallas import tpu as pltpu

HIDDEN = 32
INPUT = 1
NUM_LAYERS = 2
OUTPUT = 1


def gru_model_forward(x, params):
    B, T, I = x.shape
    assert I == INPUT
    H = HIDDEN
    f32 = jnp.float32
    bf16 = jnp.bfloat16

    def split3(w):  # (rows, 3H) -> per-gate (rows, H) in PyTorch order [r, z, n]
        return w[:, 0 * H:1 * H], w[:, 1 * H:2 * H], w[:, 2 * H:3 * H]

    # ------------------------------------------------------------------ layer 0
    wih0 = params["wih0"]                                  # (1, 3H) f32
    whh0_bf = params["whh0"].astype(bf16)                  # (H, 3H) bf16
    bih0_r, bih0_z, bih0_n = split3(params["bih0"])
    bhh0_r, bhh0_z, bhh0_n = split3(params["bhh0"])
    # Pre-summed r/z biases; b_hn kept separate (added to the recurrent dot so
    # that n0 = tanh(gi0_n + r0 * (gh0_n + b_hn)) matches torch.nn.GRU).
    b0_full = jnp.concatenate([bih0_r + bhh0_r, bih0_z + bhh0_z, bih0_n], axis=1)
    gb0 = jnp.concatenate([jnp.zeros((1, 2 * H), f32), bhh0_n], axis=1)
    l0slab = jnp.concatenate([wih0, b0_full, gb0], axis=0)  # (3, 3H) f32

    # ------------------------------------------------------------------ layer 1
    wih1_r, wih1_z, wih1_n = split3(params["wih1"])
    whh1_r, whh1_z, whh1_n = split3(params["whh1"])
    zH = jnp.zeros((H, H), f32)
    #            cols:  [ r+z fused (gi+gh summed in MXU) | gi_n | gh_n ]
    w1_top = jnp.concatenate([wih1_r, wih1_z, wih1_n, zH], axis=1)      # x = h0
    w1_bot = jnp.concatenate([whh1_r, whh1_z, zH, whh1_n], axis=1)      # x = h1
    w1_bf = jnp.concatenate([w1_top, w1_bot], axis=0).astype(bf16)      # (2H, 4H)

    bih1_r, bih1_z, bih1_n = split3(params["bih1"])
    bhh1_r, bhh1_z, bhh1_n = split3(params["bhh1"])
    b1_full = jnp.concatenate(
        [bih1_r + bhh1_r, bih1_z + bhh1_z, bih1_n, bhh1_n], axis=1)      # (1, 4H)

    # ------------------------------------------------------------------ fc tail
    wfc_row = params["wfc"].T                                            # (1, H)
    pad = jnp.zeros((1, 4 * H - H - OUTPUT), f32)
    tail = jnp.concatenate(
        [b1_full, jnp.concatenate([wfc_row, params["bfc"], pad], axis=1)],
        axis=0)                                                          # (2, 4H)

    # Time-major, flattened so the hoisted layer-0 projection is one dense
    # (T*B, 3H) array indexed with static sublane slices.
    x_flat = jnp.transpose(x, (1, 0, 2)).reshape(T * B, I)               # (T*B, 1)

    def kernel(x_ref, l0_ref, whh0_ref, w1_ref, tail_ref, out_ref):
        # ---- hoisted loads: whole weight/bias set stays live (~10 vregs).
        l0 = l0_ref[...]                     # (3, 3H) f32
        wih0_v = l0[0:1, :]                  # (1, 3H)
        b0_v = l0[1:2, :]                    # (1, 3H)  [b_ir+b_hr | b_iz+b_hz | b_in]
        gb0_v = l0[2:3, :]                   # (1, 3H)  [0 | 0 | b_hn]
        whh0 = whh0_ref[...]                 # (H, 3H) bf16
        w1 = w1_ref[...]                     # (2H, 4H) bf16
        tail_v = tail_ref[...]               # (2, 4H) f32
        b1 = tail_v[0:1, :]                  # (1, 4H)
        wfc = tail_v[1:2, 0:H]               # (1, H)
        bfc = tail_v[1:2, H:H + OUTPUT]      # (1, 1)

        # ---- layer-0 input projection for ALL timesteps (INPUT == 1 =>
        # broadcast multiply on the VPU, off the serial recurrent chain).
        gi0 = x_ref[...] * wih0_v + b0_v     # (T*B, 3H) f32, ~2 vregs live

        h0 = jnp.zeros((B, H), f32)
        h1 = jnp.zeros((B, H), f32)

        # T is small and static -> unrolled; 2 bf16 MXU dots per step.
        for t in range(T):
            gi0_t = gi0[t * B:(t + 1) * B, :]            # (B, 3H) static slice

            # ---------------- layer 0: one (B,H)@(H,3H) dot ----------------
            gh0 = jnp.dot(h0.astype(jnp.bfloat16), whh0,
                          preferred_element_type=f32) + gb0_v            # (B, 3H)
            rz0 = jax.nn.sigmoid(gi0_t[:, :2 * H] + gh0[:, :2 * H])
            r0 = rz0[:, :H]
            z0 = rz0[:, H:]
            n0 = jnp.tanh(gi0_t[:, 2 * H:] + r0 * gh0[:, 2 * H:])
            h0 = (1.0 - z0) * n0 + z0 * h0

            # ------------- layer 1: one (B,2H)@(2H,4H) dot ------------------
            # K-concat fuses gi1+gh1 for r/z inside the MXU accumulator;
            # the n gate keeps gi1_n (cols 2H:3H) and gh1_n (cols 3H:4H) split.
            hcat = jnp.concatenate([h0, h1], axis=1).astype(jnp.bfloat16)  # (B, 2H)
            g1 = jnp.dot(hcat, w1, preferred_element_type=f32) + b1        # (B, 4H)
            rz1 = jax.nn.sigmoid(g1[:, :2 * H])
            r1 = rz1[:, :H]
            z1 = rz1[:, H:]
            n1 = jnp.tanh(g1[:, 2 * H:3 * H] + r1 * g1[:, 3 * H:])
            h1 = (1.0 - z1) * n1 + z1 * h1

        # Final linear head on the last top-layer hidden state (f32).
        out_ref[...] = (jnp.sum(h1 * wfc, axis=-1, keepdims=True)
                        + bfc).astype(out_ref.dtype)

    args = (x_flat, l0slab, whh0_bf, w1_bf, tail)

    # Advisory cost so XLA can overlap surrounding ops with this tiny,
    # latency-bound kernel: 2 fused dots per step.
    cost = pl.CostEstimate(
        flops=int(T * (2 * B * H * 3 * H + 2 * B * 2 * H * 4 * H)
                  + 2 * B * H * OUTPUT),
        transcendentals=int(T * B * 6 * H),
        bytes_accessed=int(sum(int(a.size) * a.dtype.itemsize for a in args)
                           + B * OUTPUT * 4))

    vmem = pl.BlockSpec(memory_space=pltpu.MemorySpace.VMEM)
    # Grid-less single program on purpose: the kernel is serial-latency bound
    # on the T-step recurrence; at B=2 a batch grid / megacore split adds
    # overhead without shortening the chain. Total working set << 64 MiB.
    return pl.pallas_call(
        kernel,
        out_shape=jax.ShapeDtypeStruct((B, OUTPUT), jnp.float32),
        in_specs=[vmem] * len(args),
        out_specs=vmem,
        cost_estimate=cost,
    )(*args)


def init_params(key):
    # PyTorch default init: U(-1/sqrt(H), 1/sqrt(H)) for GRU and Linear(H, 1).
    k = 1.0 / jnp.sqrt(jnp.float32(HIDDEN))
    keys = jax.random.split(key, 10)

    def u(kk, shape, bound):
        return jax.random.uniform(kk, shape, jnp.float32, -bound, bound)

    return {
        # layer 0: weight_ih (3H, I) -> transposed (I, 3H); weight_hh (3H, H) -> (H, 3H)
        "wih0": u(keys[0], (INPUT, 3 * HIDDEN), k),
        "whh0": u(keys[1], (HIDDEN, 3 * HIDDEN), k),
        "bih0": u(keys[2], (1, 3 * HIDDEN), k),
        "bhh0": u(keys[3], (1, 3 * HIDDEN), k),
        # layer 1: input is hidden
        "wih1": u(keys[4], (HIDDEN, 3 * HIDDEN), k),
        "whh1": u(keys[5], (HIDDEN, 3 * HIDDEN), k),
        "bih1": u(keys[6], (1, 3 * HIDDEN), k),
        "bhh1": u(keys[7], (1, 3 * HIDDEN), k),
        # fc: (OUTPUT, HIDDEN) -> transposed (HIDDEN, OUTPUT)
        "wfc": u(keys[8], (HIDDEN, OUTPUT), k),
        "bfc": u(keys[9], (1, OUTPUT), k),
    }


def reference_forward(x, p, mirror_kernel_precision=False):
    # Pure-JAX reference replicating torch.nn.GRU (2 layers, batch_first) + Linear.
    # mirror_kernel_precision=True also casts recurrent / layer-1 matmul
    # operands to bf16 (f32 accumulate), mirroring the kernel's MXU numerics.
    B, T, _ = x.shape
    H = HIDDEN

    def mm32(a, w):
        return jnp.dot(a, w, preferred_element_type=jnp.float32)

    if mirror_kernel_precision:
        def mmbf(a, w):
            return jnp.dot(a.astype(jnp.bfloat16), w.astype(jnp.bfloat16),
                           preferred_element_type=jnp.float32)
    else:
        mmbf = mm32

    def cell(x_t, h, wih, whh, bih, bhh, mm_in, mm_h):
        gi = mm_in(x_t, wih) + bih
        gh = mm_h(h, whh) + bhh
        r = jax.nn.sigmoid(gi[:, :H] + gh[:, :H])
        z = jax.nn.sigmoid(gi[:, H:2 * H] + gh[:, H:2 * H])
        n = jnp.tanh(gi[:, 2 * H:] + r * gh[:, 2 * H:])
        return (1.0 - z) * n + z * h

    h0 = jnp.zeros((B, H), jnp.float32)
    h1 = jnp.zeros((B, H), jnp.float32)
    for t in range(T):
        # layer-0 input projection is f32 in the kernel too (INPUT == 1 broadcast)
        h0 = cell(x[:, t, :], h0, p["wih0"], p["whh0"], p["bih0"], p["bhh0"],
                  mm_in=mm32, mm_h=mmbf)
        h1 = cell(h0, h1, p["wih1"], p["whh1"], p["bih1"], p["bhh1"],
                  mm_in=mmbf, mm_h=mmbf)
    return mm32(h1, p["wfc"]) + p["bfc"]


if __name__ == "__main__":
    key = jax.random.PRNGKey(0)
    k_param, k_x = jax.random.split(key)

    batch, seq = 2, 8
    x = jax.random.normal(k_x, (batch, seq, INPUT), jnp.float32)
    params = init_params(k_param)

    out = gru_model_forward(x, params)
    out = jax.block_until_ready(out)
    assert out.shape == (batch, OUTPUT)

    # Tight check vs a reference mirroring the kernel's bf16-MXU numerics.
    ref_mirror = reference_forward(x, params, mirror_kernel_precision=True)
    assert jnp.allclose(out, ref_mirror, atol=1e-4, rtol=1e-4), (out, ref_mirror)

    # Loose sanity check vs the exact f32 PyTorch-equivalent semantics
    # (bf16 recurrent matmuls introduce only a small precision difference).
    ref_f32 = reference_forward(x, params, mirror_kernel_precision=False)
    assert jnp.allclose(out, ref_f32, atol=5e-2, rtol=5e-2), (out, ref_f32)

    print("KERNEL_OK")
</pallas_src>

<mosaic_0001>
module attributes {stable_mosaic.version = 11 : i64} {
  func.func @kernel(%arg0: memref<16x1xf32, #tpu.memory_space<vmem>>, %arg1: memref<3x96xf32, #tpu.memory_space<vmem>>, %arg2: memref<32x96xbf16, #tpu.memory_space<vmem>>, %arg3: memref<64x128xbf16, #tpu.memory_space<vmem>>, %arg4: memref<2x128xf32, #tpu.memory_space<vmem>>, %arg5: memref<2x1xf32, #tpu.memory_space<vmem>>) attributes {dimension_semantics = [], scalar_prefetch = 0 : i64, scratch_operands = 0 : i64, tpu.core_type = #tpu.core_type<tc>} {
    %c0 = arith.constant 0 : index
    %c0_0 = arith.constant 0 : index
    %0 = vector.load %arg1[%c0, %c0_0] : memref<3x96xf32, #tpu.memory_space<vmem>>, vector<3x96xf32>
    %1 = vector.extract_strided_slice %0 {offsets = [0, 0], sizes = [1, 96], strides = [1, 1]} : vector<3x96xf32> to vector<1x96xf32>
    %2 = vector.extract_strided_slice %0 {offsets = [1, 0], sizes = [1, 96], strides = [1, 1]} : vector<3x96xf32> to vector<1x96xf32>
    %3 = vector.extract_strided_slice %0 {offsets = [2, 0], sizes = [1, 96], strides = [1, 1]} : vector<3x96xf32> to vector<1x96xf32>
    %c0_1 = arith.constant 0 : index
    %c0_2 = arith.constant 0 : index
    %4 = vector.load %arg2[%c0_1, %c0_2] : memref<32x96xbf16, #tpu.memory_space<vmem>>, vector<32x96xbf16>
    %c0_3 = arith.constant 0 : index
    %c0_4 = arith.constant 0 : index
    %5 = vector.load %arg3[%c0_3, %c0_4] : memref<64x128xbf16, #tpu.memory_space<vmem>>, vector<64x128xbf16>
    %c0_5 = arith.constant 0 : index
    %c0_6 = arith.constant 0 : index
    %6 = vector.load %arg4[%c0_5, %c0_6] : memref<2x128xf32, #tpu.memory_space<vmem>>, vector<2x128xf32>
    %7 = vector.extract_strided_slice %6 {offsets = [0, 0], sizes = [1, 128], strides = [1, 1]} : vector<2x128xf32> to vector<1x128xf32>
    %8 = vector.extract_strided_slice %6 {offsets = [1, 0], sizes = [1, 32], strides = [1, 1]} : vector<2x128xf32> to vector<1x32xf32>
    %9 = vector.extract_strided_slice %6 {offsets = [1, 32], sizes = [1, 1], strides = [1, 1]} : vector<2x128xf32> to vector<1x1xf32>
    %c0_7 = arith.constant 0 : index
    %c0_8 = arith.constant 0 : index
    %10 = vector.load %arg0[%c0_7, %c0_8] : memref<16x1xf32, #tpu.memory_space<vmem>>, vector<16x1xf32>
    %11 = vector.broadcast %10 : vector<16x1xf32> to vector<16x96xf32>
    %12 = vector.broadcast %1 : vector<1x96xf32> to vector<16x96xf32>
    %13 = arith.mulf %11, %12 : vector<16x96xf32>
    %14 = vector.broadcast %2 : vector<1x96xf32> to vector<16x96xf32>
    %15 = arith.addf %13, %14 : vector<16x96xf32>
    %cst = arith.constant 0.000000e+00 : f32
    %16 = vector.broadcast %cst : f32 to vector<2x32xf32>
    %cst_9 = arith.constant 0.000000e+00 : f32
    %17 = vector.broadcast %cst_9 : f32 to vector<2x32xf32>
    %18 = vector.extract_strided_slice %15 {offsets = [0, 0], sizes = [2, 96], strides = [1, 1]} : vector<16x96xf32> to vector<2x96xf32>
    %19 = arith.truncf %16 : vector<2x32xf32> to vector<2x32xbf16>
    %cst_10 = arith.constant dense<0.000000e+00> : vector<2x96xf32>
    %20 = tpu.matmul %19, %4, %cst_10 {dimension_numbers = #tpu.dot_dimension_numbers<[1], [0], [0], [1], [0, 0, 1, 1], [], []>} : vector<2x32xbf16>, vector<32x96xbf16>, vector<2x96xf32> -> vector<2x96xf32>
    %21 = vector.broadcast %3 : vector<1x96xf32> to vector<2x96xf32>
    %22 = arith.addf %20, %21 : vector<2x96xf32>
    %23 = vector.extract_strided_slice %18 {offsets = [0, 0], sizes = [2, 64], strides = [1, 1]} : vector<2x96xf32> to vector<2x64xf32>
    %24 = vector.extract_strided_slice %22 {offsets = [0, 0], sizes = [2, 64], strides = [1, 1]} : vector<2x96xf32> to vector<2x64xf32>
    %25 = arith.addf %23, %24 : vector<2x64xf32>
    %26 = arith.negf %25 : vector<2x64xf32>
    %27 = math.exp %26 : vector<2x64xf32>
    %cst_11 = arith.constant 1.000000e+00 : f32
    %28 = vector.broadcast %cst_11 : f32 to vector<2x64xf32>
    %29 = arith.addf %28, %27 : vector<2x64xf32>
    %30 = arith.divf %28, %29 : vector<2x64xf32>
    %31 = vector.extract_strided_slice %30 {offsets = [0, 0], sizes = [2, 32], strides = [1, 1]} : vector<2x64xf32> to vector<2x32xf32>
    %32 = vector.extract_strided_slice %30 {offsets = [0, 32], sizes = [2, 32], strides = [1, 1]} : vector<2x64xf32> to vector<2x32xf32>
    %33 = vector.extract_strided_slice %18 {offsets = [0, 64], sizes = [2, 32], strides = [1, 1]} : vector<2x96xf32> to vector<2x32xf32>
    %34 = vector.extract_strided_slice %22 {offsets = [0, 64], sizes = [2, 32], strides = [1, 1]} : vector<2x96xf32> to vector<2x32xf32>
    %35 = arith.mulf %31, %34 : vector<2x32xf32>
    %36 = arith.addf %33, %35 : vector<2x32xf32>
    %37 = math.tanh %36 : vector<2x32xf32>
    %cst_12 = arith.constant 1.000000e+00 : f32
    %38 = vector.broadcast %cst_12 : f32 to vector<2x32xf32>
    %39 = arith.subf %38, %32 : vector<2x32xf32>
    %40 = arith.mulf %39, %37 : vector<2x32xf32>
    %41 = arith.mulf %32, %16 : vector<2x32xf32>
    %42 = arith.addf %40, %41 : vector<2x32xf32>
    %43 = tpu.concatenate %42, %17 in 1 : vector<2x32xf32>, vector<2x32xf32> -> vector<2x64xf32>
    %44 = arith.truncf %43 : vector<2x64xf32> to vector<2x64xbf16>
    %cst_13 = arith.constant dense<0.000000e+00> : vector<2x128xf32>
    %45 = tpu.matmul %44, %5, %cst_13 {dimension_numbers = #tpu.dot_dimension_numbers<[1], [0], [0], [1], [0, 0, 1, 1], [], []>} : vector<2x64xbf16>, vector<64x128xbf16>, vector<2x128xf32> -> vector<2x128xf32>
    %46 = vector.broadcast %7 : vector<1x128xf32> to vector<2x128xf32>
    %47 = arith.addf %45, %46 : vector<2x128xf32>
    %48 = vector.extract_strided_slice %47 {offsets = [0, 0], sizes = [2, 64], strides = [1, 1]} : vector<2x128xf32> to vector<2x64xf32>
    %49 = arith.negf %48 : vector<2x64xf32>
    %50 = math.exp %49 : vector<2x64xf32>
    %cst_14 = arith.constant 1.000000e+00 : f32
    %51 = vector.broadcast %cst_14 : f32 to vector<2x64xf32>
    %52 = arith.addf %51, %50 : vector<2x64xf32>
    %53 = arith.divf %51, %52 : vector<2x64xf32>
    %54 = vector.extract_strided_slice %53 {offsets = [0, 0], sizes = [2, 32], strides = [1, 1]} : vector<2x64xf32> to vector<2x32xf32>
    %55 = vector.extract_strided_slice %53 {offsets = [0, 32], sizes = [2, 32], strides = [1, 1]} : vector<2x64xf32> to vector<2x32xf32>
    %56 = vector.extract_strided_slice %47 {offsets = [0, 64], sizes = [2, 32], strides = [1, 1]} : vector<2x128xf32> to vector<2x32xf32>
    %57 = vector.extract_strided_slice %47 {offsets = [0, 96], sizes = [2, 32], strides = [1, 1]} : vector<2x128xf32> to vector<2x32xf32>
    %58 = arith.mulf %54, %57 : vector<2x32xf32>
    %59 = arith.addf %56, %58 : vector<2x32xf32>
    %60 = math.tanh %59 : vector<2x32xf32>
    %cst_15 = arith.constant 1.000000e+00 : f32
    %61 = vector.broadcast %cst_15 : f32 to vector<2x32xf32>
    %62 = arith.subf %61, %55 : vector<2x32xf32>
    %63 = arith.mulf %62, %60 : vector<2x32xf32>
    %64 = arith.mulf %55, %17 : vector<2x32xf32>
    %65 = arith.addf %63, %64 : vector<2x32xf32>
    %66 = vector.extract_strided_slice %15 {offsets = [2, 0], sizes = [2, 96], strides = [1, 1]} : vector<16x96xf32> to vector<2x96xf32>
    %67 = arith.truncf %42 : vector<2x32xf32> to vector<2x32xbf16>
    %cst_16 = arith.constant dense<0.000000e+00> : vector<2x96xf32>
    %68 = tpu.matmul %67, %4, %cst_16 {dimension_numbers = #tpu.dot_dimension_numbers<[1], [0], [0], [1], [0, 0, 1, 1], [], []>} : vector<2x32xbf16>, vector<32x96xbf16>, vector<2x96xf32> -> vector<2x96xf32>
    %69 = vector.broadcast %3 : vector<1x96xf32> to vector<2x96xf32>
    %70 = arith.addf %68, %69 : vector<2x96xf32>
    %71 = vector.extract_strided_slice %66 {offsets = [0, 0], sizes = [2, 64], strides = [1, 1]} : vector<2x96xf32> to vector<2x64xf32>
    %72 = vector.extract_strided_slice %70 {offsets = [0, 0], sizes = [2, 64], strides = [1, 1]} : vector<2x96xf32> to vector<2x64xf32>
    %73 = arith.addf %71, %72 : vector<2x64xf32>
    %74 = arith.negf %73 : vector<2x64xf32>
    %75 = math.exp %74 : vector<2x64xf32>
    %cst_17 = arith.constant 1.000000e+00 : f32
    %76 = vector.broadcast %cst_17 : f32 to vector<2x64xf32>
    %77 = arith.addf %76, %75 : vector<2x64xf32>
    %78 = arith.divf %76, %77 : vector<2x64xf32>
    %79 = vector.extract_strided_slice %78 {offsets = [0, 0], sizes = [2, 32], strides = [1, 1]} : vector<2x64xf32> to vector<2x32xf32>
    %80 = vector.extract_strided_slice %78 {offsets = [0, 32], sizes = [2, 32], strides = [1, 1]} : vector<2x64xf32> to vector<2x32xf32>
    %81 = vector.extract_strided_slice %66 {offsets = [0, 64], sizes = [2, 32], strides = [1, 1]} : vector<2x96xf32> to vector<2x32xf32>
    %82 = vector.extract_strided_slice %70 {offsets = [0, 64], sizes = [2, 32], strides = [1, 1]} : vector<2x96xf32> to vector<2x32xf32>
    %83 = arith.mulf %79, %82 : vector<2x32xf32>
    %84 = arith.addf %81, %83 : vector<2x32xf32>
    %85 = math.tanh %84 : vector<2x32xf32>
    %cst_18 = arith.constant 1.000000e+00 : f32
    %86 = vector.broadcast %cst_18 : f32 to vector<2x32xf32>
    %87 = arith.subf %86, %80 : vector<2x32xf32>
    %88 = arith.mulf %87, %85 : vector<2x32xf32>
    %89 = arith.mulf %80, %42 : vector<2x32xf32>
    %90 = arith.addf %88, %89 : vector<2x32xf32>
    %91 = tpu.concatenate %90, %65 in 1 : vector<2x32xf32>, vector<2x32xf32> -> vector<2x64xf32>
    %92 = arith.truncf %91 : vector<2x64xf32> to vector<2x64xbf16>
    %cst_19 = arith.constant dense<0.000000e+00> : vector<2x128xf32>
    %93 = tpu.matmul %92, %5, %cst_19 {dimension_numbers = #tpu.dot_dimension_numbers<[1], [0], [0], [1], [0, 0, 1, 1], [], []>} : vector<2x64xbf16>, vector<64x128xbf16>, vector<2x128xf32> -> vector<2x128xf32>
    %94 = vector.broadcast %7 : vector<1x128xf32> to vector<2x128xf32>
    %95 = arith.addf %93, %94 : vector<2x128xf32>
    %96 = vector.extract_strided_slice %95 {offsets = [0, 0], sizes = [2, 64], strides = [1, 1]} : vector<2x128xf32> to vector<2x64xf32>
    %97 = arith.negf %96 : vector<2x64xf32>
    %98 = math.exp %97 : vector<2x64xf32>
    %cst_20 = arith.constant 1.000000e+00 : f32
    %99 = vector.broadcast %cst_20 : f32 to vector<2x64xf32>
    %100 = arith.addf %99, %98 : vector<2x64xf32>
    %101 = arith.divf %99, %100 : vector<2x64xf32>
    %102 = vector.extract_strided_slice %101 {offsets = [0, 0], sizes = [2, 32], strides = [1, 1]} : vector<2x64xf32> to vector<2x32xf32>
    %103 = vector.extract_strided_slice %101 {offsets = [0, 32], sizes = [2, 32], strides = [1, 1]} : vector<2x64xf32> to vector<2x32xf32>
    %104 = vector.extract_strided_slice %95 {offsets = [0, 64], sizes = [2, 32], strides = [1, 1]} : vector<2x128xf32> to vector<2x32xf32>
    %105 = vector.extract_strided_slice %95 {offsets = [0, 96], sizes = [2, 32], strides = [1, 1]} : vector<2x128xf32> to vector<2x32xf32>
    %106 = arith.mulf %102, %105 : vector<2x32xf32>
    %107 = arith.addf %104, %106 : vector<2x32xf32>
    %108 = math.tanh %107 : vector<2x32xf32>
    %cst_21 = arith.constant 1.000000e+00 : f32
    %109 = vector.broadcast %cst_21 : f32 to vector<2x32xf32>
    %110 = arith.subf %109, %103 : vector<2x32xf32>
    %111 = arith.mulf %110, %108 : vector<2x32xf32>
    %112 = arith.mulf %103, %65 : vector<2x32xf32>
    %113 = arith.addf %111, %112 : vector<2x32xf32>
    %114 = vector.extract_strided_slice %15 {offsets = [4, 0], sizes = [2, 96], strides = [1, 1]} : vector<16x96xf32> to vector<2x96xf32>
    %115 = arith.truncf %90 : vector<2x32xf32> to vector<2x32xbf16>
    %cst_22 = arith.constant dense<0.000000e+00> : vector<2x96xf32>
    %116 = tpu.matmul %115, %4, %cst_22 {dimension_numbers = #tpu.dot_dimension_numbers<[1], [0], [0], [1], [0, 0, 1, 1], [], []>} : vector<2x32xbf16>, vector<32x96xbf16>, vector<2x96xf32> -> vector<2x96xf32>
    %117 = vector.broadcast %3 : vector<1x96xf32> to vector<2x96xf32>
    %118 = arith.addf %116, %117 : vector<2x96xf32>
    %119 = vector.extract_strided_slice %114 {offsets = [0, 0], sizes = [2, 64], strides = [1, 1]} : vector<2x96xf32> to vector<2x64xf32>
    %120 = vector.extract_strided_slice %118 {offsets = [0, 0], sizes = [2, 64], strides = [1, 1]} : vector<2x96xf32> to vector<2x64xf32>
    %121 = arith.addf %119, %120 : vector<2x64xf32>
    %122 = arith.negf %121 : vector<2x64xf32>
    %123 = math.exp %122 : vector<2x64xf32>
    %cst_23 = arith.constant 1.000000e+00 : f32
    %124 = vector.broadcast %cst_23 : f32 to vector<2x64xf32>
    %125 = arith.addf %124, %123 : vector<2x64xf32>
    %126 = arith.divf %124, %125 : vector<2x64xf32>
    %127 = vector.extract_strided_slice %126 {offsets = [0, 0], sizes = [2, 32], strides = [1, 1]} : vector<2x64xf32> to vector<2x32xf32>
    %128 = vector.extract_strided_slice %126 {offsets = [0, 32], sizes = [2, 32], strides = [1, 1]} : vector<2x64xf32> to vector<2x32xf32>
    %129 = vector.extract_strided_slice %114 {offsets = [0, 64], sizes = [2, 32], strides = [1, 1]} : vector<2x96xf32> to vector<2x32xf32>
    %130 = vector.extract_strided_slice %118 {offsets = [0, 64], sizes = [2, 32], strides = [1, 1]} : vector<2x96xf32> to vector<2x32xf32>
    %131 = arith.mulf %127, %130 : vector<2x32xf32>
    %132 = arith.addf %129, %131 : vector<2x32xf32>
    %133 = math.tanh %132 : vector<2x32xf32>
    %cst_24 = arith.constant 1.000000e+00 : f32
    %134 = vector.broadcast %cst_24 : f32 to vector<2x32xf32>
    %135 = arith.subf %134, %128 : vector<2x32xf32>
    %136 = arith.mulf %135, %133 : vector<2x32xf32>
    %137 = arith.mulf %128, %90 : vector<2x32xf32>
    %138 = arith.addf %136, %137 : vector<2x32xf32>
    %139 = tpu.concatenate %138, %113 in 1 : vector<2x32xf32>, vector<2x32xf32> -> vector<2x64xf32>
    %140 = arith.truncf %139 : vector<2x64xf32> to vector<2x64xbf16>
    %cst_25 = arith.constant dense<0.000000e+00> : vector<2x128xf32>
    %141 = tpu.matmul %140, %5, %cst_25 {dimension_numbers = #tpu.dot_dimension_numbers<[1], [0], [0], [1], [0, 0, 1, 1], [], []>} : vector<2x64xbf16>, vector<64x128xbf16>, vector<2x128xf32> -> vector<2x128xf32>
    %142 = vector.broadcast %7 : vector<1x128xf32> to vector<2x128xf32>
    %143 = arith.addf %141, %142 : vector<2x128xf32>
    %144 = vector.extract_strided_slice %143 {offsets = [0, 0], sizes = [2, 64], strides = [1, 1]} : vector<2x128xf32> to vector<2x64xf32>
    %145 = arith.negf %144 : vector<2x64xf32>
    %146 = math.exp %145 : vector<2x64xf32>
    %cst_26 = arith.constant 1.000000e+00 : f32
    %147 = vector.broadcast %cst_26 : f32 to vector<2x64xf32>
    %148 = arith.addf %147, %146 : vector<2x64xf32>
    %149 = arith.divf %147, %148 : vector<2x64xf32>
    %150 = vector.extract_strided_slice %149 {offsets = [0, 0], sizes = [2, 32], strides = [1, 1]} : vector<2x64xf32> to vector<2x32xf32>
    %151 = vector.extract_strided_slice %149 {offsets = [0, 32], sizes = [2, 32], strides = [1, 1]} : vector<2x64xf32> to vector<2x32xf32>
    %152 = vector.extract_strided_slice %143 {offsets = [0, 64], sizes = [2, 32], strides = [1, 1]} : vector<2x128xf32> to vector<2x32xf32>
    %153 = vector.extract_strided_slice %143 {offsets = [0, 96], sizes = [2, 32], strides = [1, 1]} : vector<2x128xf32> to vector<2x32xf32>
    %154 = arith.mulf %150, %153 : vector<2x32xf32>
    %155 = arith.addf %152, %154 : vector<2x32xf32>
    %156 = math.tanh %155 : vector<2x32xf32>
    %cst_27 = arith.constant 1.000000e+00 : f32
    %157 = vector.broadcast %cst_27 : f32 to vector<2x32xf32>
    %158 = arith.subf %157, %151 : vector<2x32xf32>
    %159 = arith.mulf %158, %156 : vector<2x32xf32>
    %160 = arith.mulf %151, %113 : vector<2x32xf32>
    %161 = arith.addf %159, %160 : vector<2x32xf32>
    %162 = vector.extract_strided_slice %15 {offsets = [6, 0], sizes = [2, 96], strides = [1, 1]} : vector<16x96xf32> to vector<2x96xf32>
    %163 = arith.truncf %138 : vector<2x32xf32> to vector<2x32xbf16>
    %cst_28 = arith.constant dense<0.000000e+00> : vector<2x96xf32>
    %164 = tpu.matmul %163, %4, %cst_28 {dimension_numbers = #tpu.dot_dimension_numbers<[1], [0], [0], [1], [0, 0, 1, 1], [], []>} : vector<2x32xbf16>, vector<32x96xbf16>, vector<2x96xf32> -> vector<2x96xf32>
    %165 = vector.broadcast %3 : vector<1x96xf32> to vector<2x96xf32>
    %166 = arith.addf %164, %165 : vector<2x96xf32>
    %167 = vector.extract_strided_slice %162 {offsets = [0, 0], sizes = [2, 64], strides = [1, 1]} : vector<2x96xf32> to vector<2x64xf32>
    %168 = vector.extract_strided_slice %166 {offsets = [0, 0], sizes = [2, 64], strides = [1, 1]} : vector<2x96xf32> to vector<2x64xf32>
    %169 = arith.addf %167, %168 : vector<2x64xf32>
    %170 = arith.negf %169 : vector<2x64xf32>
    %171 = math.exp %170 : vector<2x64xf32>
    %cst_29 = arith.constant 1.000000e+00 : f32
    %172 = vector.broadcast %cst_29 : f32 to vector<2x64xf32>
    %173 = arith.addf %172, %171 : vector<2x64xf32>
    %174 = arith.divf %172, %173 : vector<2x64xf32>
    %175 = vector.extract_strided_slice %174 {offsets = [0, 0], sizes = [2, 32], strides = [1, 1]} : vector<2x64xf32> to vector<2x32xf32>
    %176 = vector.extract_strided_slice %174 {offsets = [0, 32], sizes = [2, 32], strides = [1, 1]} : vector<2x64xf32> to vector<2x32xf32>
    %177 = vector.extract_strided_slice %162 {offsets = [0, 64], sizes = [2, 32], strides = [1, 1]} : vector<2x96xf32> to vector<2x32xf32>
    %178 = vector.extract_strided_slice %166 {offsets = [0, 64], sizes = [2, 32], strides = [1, 1]} : vector<2x96xf32> to vector<2x32xf32>
    %179 = arith.mulf %175, %178 : vector<2x32xf32>
    %180 = arith.addf %177, %179 : vector<2x32xf32>
    %181 = math.tanh %180 : vector<2x32xf32>
    %cst_30 = arith.constant 1.000000e+00 : f32
    %182 = vector.broadcast %cst_30 : f32 to vector<2x32xf32>
    %183 = arith.subf %182, %176 : vector<2x32xf32>
    %184 = arith.mulf %183, %181 : vector<2x32xf32>
    %185 = arith.mulf %176, %138 : vector<2x32xf32>
    %186 = arith.addf %184, %185 : vector<2x32xf32>
    %187 = tpu.concatenate %186, %161 in 1 : vector<2x32xf32>, vector<2x32xf32> -> vector<2x64xf32>
    %188 = arith.truncf %187 : vector<2x64xf32> to vector<2x64xbf16>
    %cst_31 = arith.constant dense<0.000000e+00> : vector<2x128xf32>
    %189 = tpu.matmul %188, %5, %cst_31 {dimension_numbers = #tpu.dot_dimension_numbers<[1], [0], [0], [1], [0, 0, 1, 1], [], []>} : vector<2x64xbf16>, vector<64x128xbf16>, vector<2x128xf32> -> vector<2x128xf32>
    %190 = vector.broadcast %7 : vector<1x128xf32> to vector<2x128xf32>
    %191 = arith.addf %189, %190 : vector<2x128xf32>
    %192 = vector.extract_strided_slice %191 {offsets = [0, 0], sizes = [2, 64], strides = [1, 1]} : vector<2x128xf32> to vector<2x64xf32>
    %193 = arith.negf %192 : vector<2x64xf32>
    %194 = math.exp %193 : vector<2x64xf32>
    %cst_32 = arith.constant 1.000000e+00 : f32
    %195 = vector.broadcast %cst_32 : f32 to vector<2x64xf32>
    %196 = arith.addf %195, %194 : vector<2x64xf32>
    %197 = arith.divf %195, %196 : vector<2x64xf32>
    %198 = vector.extract_strided_slice %197 {offsets = [0, 0], sizes = [2, 32], strides = [1, 1]} : vector<2x64xf32> to vector<2x32xf32>
    %199 = vector.extract_strided_slice %197 {offsets = [0, 32], sizes = [2, 32], strides = [1, 1]} : vector<2x64xf32> to vector<2x32xf32>
    %200 = vector.extract_strided_slice %191 {offsets = [0, 64], sizes = [2, 32], strides = [1, 1]} : vector<2x128xf32> to vector<2x32xf32>
    %201 = vector.extract_strided_slice %191 {offsets = [0, 96], sizes = [2, 32], strides = [1, 1]} : vector<2x128xf32> to vector<2x32xf32>
    %202 = arith.mulf %198, %201 : vector<2x32xf32>
    %203 = arith.addf %200, %202 : vector<2x32xf32>
    %204 = math.tanh %203 : vector<2x32xf32>
    %cst_33 = arith.constant 1.000000e+00 : f32
    %205 = vector.broadcast %cst_33 : f32 to vector<2x32xf32>
    %206 = arith.subf %205, %199 : vector<2x32xf32>
    %207 = arith.mulf %206, %204 : vector<2x32xf32>
    %208 = arith.mulf %199, %161 : vector<2x32xf32>
    %209 = arith.addf %207, %208 : vector<2x32xf32>
    %210 = vector.extract_strided_slice %15 {offsets = [8, 0], sizes = [2, 96], strides = [1, 1]} : vector<16x96xf32> to vector<2x96xf32>
    %211 = arith.truncf %186 : vector<2x32xf32> to vector<2x32xbf16>
    %cst_34 = arith.constant dense<0.000000e+00> : vector<2x96xf32>
    %212 = tpu.matmul %211, %4, %cst_34 {dimension_numbers = #tpu.dot_dimension_numbers<[1], [0], [0], [1], [0, 0, 1, 1], [], []>} : vector<2x32xbf16>, vector<32x96xbf16>, vector<2x96xf32> -> vector<2x96xf32>
    %213 = vector.broadcast %3 : vector<1x96xf32> to vector<2x96xf32>
    %214 = arith.addf %212, %213 : vector<2x96xf32>
    %215 = vector.extract_strided_slice %210 {offsets = [0, 0], sizes = [2, 64], strides = [1, 1]} : vector<2x96xf32> to vector<2x64xf32>
    %216 = vector.extract_strided_slice %214 {offsets = [0, 0], sizes = [2, 64], strides = [1, 1]} : vector<2x96xf32> to vector<2x64xf32>
    %217 = arith.addf %215, %216 : vector<2x64xf32>
    %218 = arith.negf %217 : vector<2x64xf32>
    %219 = math.exp %218 : vector<2x64xf32>
    %cst_35 = arith.constant 1.000000e+00 : f32
    %220 = vector.broadcast %cst_35 : f32 to vector<2x64xf32>
    %221 = arith.addf %220, %219 : vector<2x64xf32>
    %222 = arith.divf %220, %221 : vector<2x64xf32>
    %223 = vector.extract_strided_slice %222 {offsets = [0, 0], sizes = [2, 32], strides = [1, 1]} : vector<2x64xf32> to vector<2x32xf32>
    %224 = vector.extract_strided_slice %222 {offsets = [0, 32], sizes = [2, 32], strides = [1, 1]} : vector<2x64xf32> to vector<2x32xf32>
    %225 = vector.extract_strided_slice %210 {offsets = [0, 64], sizes = [2, 32], strides = [1, 1]} : vector<2x96xf32> to vector<2x32xf32>
    %226 = vector.extract_strided_slice %214 {offsets = [0, 64], sizes = [2, 32], strides = [1, 1]} : vector<2x96xf32> to vector<2x32xf32>
    %227 = arith.mulf %223, %226 : vector<2x32xf32>
    %228 = arith.addf %225, %227 : vector<2x32xf32>
    %229 = math.tanh %228 : vector<2x32xf32>
    %cst_36 = arith.constant 1.000000e+00 : f32
    %230 = vector.broadcast %cst_36 : f32 to vector<2x32xf32>
    %231 = arith.subf %230, %224 : vector<2x32xf32>
    %232 = arith.mulf %231, %229 : vector<2x32xf32>
    %233 = arith.mulf %224, %186 : vector<2x32xf32>
    %234 = arith.addf %232, %233 : vector<2x32xf32>
    %235 = tpu.concatenate %234, %209 in 1 : vector<2x32xf32>, vector<2x32xf32> -> vector<2x64xf32>
    %236 = arith.truncf %235 : vector<2x64xf32> to vector<2x64xbf16>
    %cst_37 = arith.constant dense<0.000000e+00> : vector<2x128xf32>
    %237 = tpu.matmul %236, %5, %cst_37 {dimension_numbers = #tpu.dot_dimension_numbers<[1], [0], [0], [1], [0, 0, 1, 1], [], []>} : vector<2x64xbf16>, vector<64x128xbf16>, vector<2x128xf32> -> vector<2x128xf32>
    %238 = vector.broadcast %7 : vector<1x128xf32> to vector<2x128xf32>
    %239 = arith.addf %237, %238 : vector<2x128xf32>
    %240 = vector.extract_strided_slice %239 {offsets = [0, 0], sizes = [2, 64], strides = [1, 1]} : vector<2x128xf32> to vector<2x64xf32>
    %241 = arith.negf %240 : vector<2x64xf32>
    %242 = math.exp %241 : vector<2x64xf32>
    %cst_38 = arith.constant 1.000000e+00 : f32
    %243 = vector.broadcast %cst_38 : f32 to vector<2x64xf32>
    %244 = arith.addf %243, %242 : vector<2x64xf32>
    %245 = arith.divf %243, %244 : vector<2x64xf32>
    %246 = vector.extract_strided_slice %245 {offsets = [0, 0], sizes = [2, 32], strides = [1, 1]} : vector<2x64xf32> to vector<2x32xf32>
    %247 = vector.extract_strided_slice %245 {offsets = [0, 32], sizes = [2, 32], strides = [1, 1]} : vector<2x64xf32> to vector<2x32xf32>
    %248 = vector.extract_strided_slice %239 {offsets = [0, 64], sizes = [2, 32], strides = [1, 1]} : vector<2x128xf32> to vector<2x32xf32>
    %249 = vector.extract_strided_slice %239 {offsets = [0, 96], sizes = [2, 32], strides = [1, 1]} : vector<2x128xf32> to vector<2x32xf32>
    %250 = arith.mulf %246, %249 : vector<2x32xf32>
    %251 = arith.addf %248, %250 : vector<2x32xf32>
    %252 = math.tanh %251 : vector<2x32xf32>
    %cst_39 = arith.constant 1.000000e+00 : f32
    %253 = vector.broadcast %cst_39 : f32 to vector<2x32xf32>
    %254 = arith.subf %253, %247 : vector<2x32xf32>
    %255 = arith.mulf %254, %252 : vector<2x32xf32>
    %256 = arith.mulf %247, %209 : vector<2x32xf32>
    %257 = arith.addf %255, %256 : vector<2x32xf32>
    %258 = vector.extract_strided_slice %15 {offsets = [10, 0], sizes = [2, 96], strides = [1, 1]} : vector<16x96xf32> to vector<2x96xf32>
    %259 = arith.truncf %234 : vector<2x32xf32> to vector<2x32xbf16>
    %cst_40 = arith.constant dense<0.000000e+00> : vector<2x96xf32>
    %260 = tpu.matmul %259, %4, %cst_40 {dimension_numbers = #tpu.dot_dimension_numbers<[1], [0], [0], [1], [0, 0, 1, 1], [], []>} : vector<2x32xbf16>, vector<32x96xbf16>, vector<2x96xf32> -> vector<2x96xf32>
    %261 = vector.broadcast %3 : vector<1x96xf32> to vector<2x96xf32>
    %262 = arith.addf %260, %261 : vector<2x96xf32>
    %263 = vector.extract_strided_slice %258 {offsets = [0, 0], sizes = [2, 64], strides = [1, 1]} : vector<2x96xf32> to vector<2x64xf32>
    %264 = vector.extract_strided_slice %262 {offsets = [0, 0], sizes = [2, 64], strides = [1, 1]} : vector<2x96xf32> to vector<2x64xf32>
    %265 = arith.addf %263, %264 : vector<2x64xf32>
    %266 = arith.negf %265 : vector<2x64xf32>
    %267 = math.exp %266 : vector<2x64xf32>
    %cst_41 = arith.constant 1.000000e+00 : f32
    %268 = vector.broadcast %cst_41 : f32 to vector<2x64xf32>
    %269 = arith.addf %268, %267 : vector<2x64xf32>
    %270 = arith.divf %268, %269 : vector<2x64xf32>
    %271 = vector.extract_strided_slice %270 {offsets = [0, 0], sizes = [2, 32], strides = [1, 1]} : vector<2x64xf32> to vector<2x32xf32>
    %272 = vector.extract_strided_slice %270 {offsets = [0, 32], sizes = [2, 32], strides = [1, 1]} : vector<2x64xf32> to vector<2x32xf32>
    %273 = vector.extract_strided_slice %258 {offsets = [0, 64], sizes = [2, 32], strides = [1, 1]} : vector<2x96xf32> to vector<2x32xf32>
    %274 = vector.extract_strided_slice %262 {offsets = [0, 64], sizes = [2, 32], strides = [1, 1]} : vector<2x96xf32> to vector<2x32xf32>
    %275 = arith.mulf %271, %274 : vector<2x32xf32>
    %276 = arith.addf %273, %275 : vector<2x32xf32>
    %277 = math.tanh %276 : vector<2x32xf32>
    %cst_42 = arith.constant 1.000000e+00 : f32
    %278 = vector.broadcast %cst_42 : f32 to vector<2x32xf32>
    %279 = arith.subf %278, %272 : vector<2x32xf32>
    %280 = arith.mulf %279, %277 : vector<2x32xf32>
    %281 = arith.mulf %272, %234 : vector<2x32xf32>
    %282 = arith.addf %280, %281 : vector<2x32xf32>
    %283 = tpu.concatenate %282, %257 in 1 : vector<2x32xf32>, vector<2x32xf32> -> vector<2x64xf32>
    %284 = arith.truncf %283 : vector<2x64xf32> to vector<2x64xbf16>
    %cst_43 = arith.constant dense<0.000000e+00> : vector<2x128xf32>
    %285 = tpu.matmul %284, %5, %cst_43 {dimension_numbers = #tpu.dot_dimension_numbers<[1], [0], [0], [1], [0, 0, 1, 1], [], []>} : vector<2x64xbf16>, vector<64x128xbf16>, vector<2x128xf32> -> vector<2x128xf32>
    %286 = vector.broadcast %7 : vector<1x128xf32> to vector<2x128xf32>
    %287 = arith.addf %285, %286 : vector<2x128xf32>
    %288 = vector.extract_strided_slice %287 {offsets = [0, 0], sizes = [2, 64], strides = [1, 1]} : vector<2x128xf32> to vector<2x64xf32>
    %289 = arith.negf %288 : vector<2x64xf32>
    %290 = math.exp %289 : vector<2x64xf32>
    %cst_44 = arith.constant 1.000000e+00 : f32
    %291 = vector.broadcast %cst_44 : f32 to vector<2x64xf32>
    %292 = arith.addf %291, %290 : vector<2x64xf32>
    %293 = arith.divf %291, %292 : vector<2x64xf32>
    %294 = vector.extract_strided_slice %293 {offsets = [0, 0], sizes = [2, 32], strides = [1, 1]} : vector<2x64xf32> to vector<2x32xf32>
    %295 = vector.extract_strided_slice %293 {offsets = [0, 32], sizes = [2, 32], strides = [1, 1]} : vector<2x64xf32> to vector<2x32xf32>
    %296 = vector.extract_strided_slice %287 {offsets = [0, 64], sizes = [2, 32], strides = [1, 1]} : vector<2x128xf32> to vector<2x32xf32>
    %297 = vector.extract_strided_slice %287 {offsets = [0, 96], sizes = [2, 32], strides = [1, 1]} : vector<2x128xf32> to vector<2x32xf32>
    %298 = arith.mulf %294, %297 : vector<2x32xf32>
    %299 = arith.addf %296, %298 : vector<2x32xf32>
    %300 = math.tanh %299 : vector<2x32xf32>
    %cst_45 = arith.constant 1.000000e+00 : f32
    %301 = vector.broadcast %cst_45 : f32 to vector<2x32xf32>
    %302 = arith.subf %301, %295 : vector<2x32xf32>
    %303 = arith.mulf %302, %300 : vector<2x32xf32>
    %304 = arith.mulf %295, %257 : vector<2x32xf32>
    %305 = arith.addf %303, %304 : vector<2x32xf32>
    %306 = vector.extract_strided_slice %15 {offsets = [12, 0], sizes = [2, 96], strides = [1, 1]} : vector<16x96xf32> to vector<2x96xf32>
    %307 = arith.truncf %282 : vector<2x32xf32> to vector<2x32xbf16>
    %cst_46 = arith.constant dense<0.000000e+00> : vector<2x96xf32>
    %308 = tpu.matmul %307, %4, %cst_46 {dimension_numbers = #tpu.dot_dimension_numbers<[1], [0], [0], [1], [0, 0, 1, 1], [], []>} : vector<2x32xbf16>, vector<32x96xbf16>, vector<2x96xf32> -> vector<2x96xf32>
    %309 = vector.broadcast %3 : vector<1x96xf32> to vector<2x96xf32>
    %310 = arith.addf %308, %309 : vector<2x96xf32>
    %311 = vector.extract_strided_slice %306 {offsets = [0, 0], sizes = [2, 64], strides = [1, 1]} : vector<2x96xf32> to vector<2x64xf32>
    %312 = vector.extract_strided_slice %310 {offsets = [0, 0], sizes = [2, 64], strides = [1, 1]} : vector<2x96xf32> to vector<2x64xf32>
    %313 = arith.addf %311, %312 : vector<2x64xf32>
    %314 = arith.negf %313 : vector<2x64xf32>
    %315 = math.exp %314 : vector<2x64xf32>
    %cst_47 = arith.constant 1.000000e+00 : f32
    %316 = vector.broadcast %cst_47 : f32 to vector<2x64xf32>
    %317 = arith.addf %316, %315 : vector<2x64xf32>
    %318 = arith.divf %316, %317 : vector<2x64xf32>
    %319 = vector.extract_strided_slice %318 {offsets = [0, 0], sizes = [2, 32], strides = [1, 1]} : vector<2x64xf32> to vector<2x32xf32>
    %320 = vector.extract_strided_slice %318 {offsets = [0, 32], sizes = [2, 32], strides = [1, 1]} : vector<2x64xf32> to vector<2x32xf32>
    %321 = vector.extract_strided_slice %306 {offsets = [0, 64], sizes = [2, 32], strides = [1, 1]} : vector<2x96xf32> to vector<2x32xf32>
    %322 = vector.extract_strided_slice %310 {offsets = [0, 64], sizes = [2, 32], strides = [1, 1]} : vector<2x96xf32> to vector<2x32xf32>
    %323 = arith.mulf %319, %322 : vector<2x32xf32>
    %324 = arith.addf %321, %323 : vector<2x32xf32>
    %325 = math.tanh %324 : vector<2x32xf32>
    %cst_48 = arith.constant 1.000000e+00 : f32
    %326 = vector.broadcast %cst_48 : f32 to vector<2x32xf32>
    %327 = arith.subf %326, %320 : vector<2x32xf32>
    %328 = arith.mulf %327, %325 : vector<2x32xf32>
    %329 = arith.mulf %320, %282 : vector<2x32xf32>
    %330 = arith.addf %328, %329 : vector<2x32xf32>
    %331 = tpu.concatenate %330, %305 in 1 : vector<2x32xf32>, vector<2x32xf32> -> vector<2x64xf32>
    %332 = arith.truncf %331 : vector<2x64xf32> to vector<2x64xbf16>
    %cst_49 = arith.constant dense<0.000000e+00> : vector<2x128xf32>
    %333 = tpu.matmul %332, %5, %cst_49 {dimension_numbers = #tpu.dot_dimension_numbers<[1], [0], [0], [1], [0, 0, 1, 1], [], []>} : vector<2x64xbf16>, vector<64x128xbf16>, vector<2x128xf32> -> vector<2x128xf32>
    %334 = vector.broadcast %7 : vector<1x128xf32> to vector<2x128xf32>
    %335 = arith.addf %333, %334 : vector<2x128xf32>
    %336 = vector.extract_strided_slice %335 {offsets = [0, 0], sizes = [2, 64], strides = [1, 1]} : vector<2x128xf32> to vector<2x64xf32>
    %337 = arith.negf %336 : vector<2x64xf32>
    %338 = math.exp %337 : vector<2x64xf32>
    %cst_50 = arith.constant 1.000000e+00 : f32
    %339 = vector.broadcast %cst_50 : f32 to vector<2x64xf32>
    %340 = arith.addf %339, %338 : vector<2x64xf32>
    %341 = arith.divf %339, %340 : vector<2x64xf32>
    %342 = vector.extract_strided_slice %341 {offsets = [0, 0], sizes = [2, 32], strides = [1, 1]} : vector<2x64xf32> to vector<2x32xf32>
    %343 = vector.extract_strided_slice %341 {offsets = [0, 32], sizes = [2, 32], strides = [1, 1]} : vector<2x64xf32> to vector<2x32xf32>
    %344 = vector.extract_strided_slice %335 {offsets = [0, 64], sizes = [2, 32], strides = [1, 1]} : vector<2x128xf32> to vector<2x32xf32>
    %345 = vector.extract_strided_slice %335 {offsets = [0, 96], sizes = [2, 32], strides = [1, 1]} : vector<2x128xf32> to vector<2x32xf32>
    %346 = arith.mulf %342, %345 : vector<2x32xf32>
    %347 = arith.addf %344, %346 : vector<2x32xf32>
    %348 = math.tanh %347 : vector<2x32xf32>
    %cst_51 = arith.constant 1.000000e+00 : f32
    %349 = vector.broadcast %cst_51 : f32 to vector<2x32xf32>
    %350 = arith.subf %349, %343 : vector<2x32xf32>
    %351 = arith.mulf %350, %348 : vector<2x32xf32>
    %352 = arith.mulf %343, %305 : vector<2x32xf32>
    %353 = arith.addf %351, %352 : vector<2x32xf32>
    %354 = vector.extract_strided_slice %15 {offsets = [14, 0], sizes = [2, 96], strides = [1, 1]} : vector<16x96xf32> to vector<2x96xf32>
    %355 = arith.truncf %330 : vector<2x32xf32> to vector<2x32xbf16>
    %cst_52 = arith.constant dense<0.000000e+00> : vector<2x96xf32>
    %356 = tpu.matmul %355, %4, %cst_52 {dimension_numbers = #tpu.dot_dimension_numbers<[1], [0], [0], [1], [0, 0, 1, 1], [], []>} : vector<2x32xbf16>, vector<32x96xbf16>, vector<2x96xf32> -> vector<2x96xf32>
    %357 = vector.broadcast %3 : vector<1x96xf32> to vector<2x96xf32>
    %358 = arith.addf %356, %357 : vector<2x96xf32>
    %359 = vector.extract_strided_slice %354 {offsets = [0, 0], sizes = [2, 64], strides = [1, 1]} : vector<2x96xf32> to vector<2x64xf32>
    %360 = vector.extract_strided_slice %358 {offsets = [0, 0], sizes = [2, 64], strides = [1, 1]} : vector<2x96xf32> to vector<2x64xf32>
    %361 = arith.addf %359, %360 : vector<2x64xf32>
    %362 = arith.negf %361 : vector<2x64xf32>
    %363 = math.exp %362 : vector<2x64xf32>
    %cst_53 = arith.constant 1.000000e+00 : f32
    %364 = vector.broadcast %cst_53 : f32 to vector<2x64xf32>
    %365 = arith.addf %364, %363 : vector<2x64xf32>
    %366 = arith.divf %364, %365 : vector<2x64xf32>
    %367 = vector.extract_strided_slice %366 {offsets = [0, 0], sizes = [2, 32], strides = [1, 1]} : vector<2x64xf32> to vector<2x32xf32>
    %368 = vector.extract_strided_slice %366 {offsets = [0, 32], sizes = [2, 32], strides = [1, 1]} : vector<2x64xf32> to vector<2x32xf32>
    %369 = vector.extract_strided_slice %354 {offsets = [0, 64], sizes = [2, 32], strides = [1, 1]} : vector<2x96xf32> to vector<2x32xf32>
    %370 = vector.extract_strided_slice %358 {offsets = [0, 64], sizes = [2, 32], strides = [1, 1]} : vector<2x96xf32> to vector<2x32xf32>
    %371 = arith.mulf %367, %370 : vector<2x32xf32>
    %372 = arith.addf %369, %371 : vector<2x32xf32>
    %373 = math.tanh %372 : vector<2x32xf32>
    %cst_54 = arith.constant 1.000000e+00 : f32
    %374 = vector.broadcast %cst_54 : f32 to vector<2x32xf32>
    %375 = arith.subf %374, %368 : vector<2x32xf32>
    %376 = arith.mulf %375, %373 : vector<2x32xf32>
    %377 = arith.mulf %368, %330 : vector<2x32xf32>
    %378 = arith.addf %376, %377 : vector<2x32xf32>
    %379 = tpu.concatenate %378, %353 in 1 : vector<2x32xf32>, vector<2x32xf32> -> vector<2x64xf32>
    %380 = arith.truncf %379 : vector<2x64xf32> to vector<2x64xbf16>
    %cst_55 = arith.constant dense<0.000000e+00> : vector<2x128xf32>
    %381 = tpu.matmul %380, %5, %cst_55 {dimension_numbers = #tpu.dot_dimension_numbers<[1], [0], [0], [1], [0, 0, 1, 1], [], []>} : vector<2x64xbf16>, vector<64x128xbf16>, vector<2x128xf32> -> vector<2x128xf32>
    %382 = vector.broadcast %7 : vector<1x128xf32> to vector<2x128xf32>
    %383 = arith.addf %381, %382 : vector<2x128xf32>
    %384 = vector.extract_strided_slice %383 {offsets = [0, 0], sizes = [2, 64], strides = [1, 1]} : vector<2x128xf32> to vector<2x64xf32>
    %385 = arith.negf %384 : vector<2x64xf32>
    %386 = math.exp %385 : vector<2x64xf32>
    %cst_56 = arith.constant 1.000000e+00 : f32
    %387 = vector.broadcast %cst_56 : f32 to vector<2x64xf32>
    %388 = arith.addf %387, %386 : vector<2x64xf32>
    %389 = arith.divf %387, %388 : vector<2x64xf32>
    %390 = vector.extract_strided_slice %389 {offsets = [0, 0], sizes = [2, 32], strides = [1, 1]} : vector<2x64xf32> to vector<2x32xf32>
    %391 = vector.extract_strided_slice %389 {offsets = [0, 32], sizes = [2, 32], strides = [1, 1]} : vector<2x64xf32> to vector<2x32xf32>
    %392 = vector.extract_strided_slice %383 {offsets = [0, 64], sizes = [2, 32], strides = [1, 1]} : vector<2x128xf32> to vector<2x32xf32>
    %393 = vector.extract_strided_slice %383 {offsets = [0, 96], sizes = [2, 32], strides = [1, 1]} : vector<2x128xf32> to vector<2x32xf32>
    %394 = arith.mulf %390, %393 : vector<2x32xf32>
    %395 = arith.addf %392, %394 : vector<2x32xf32>
    %396 = math.tanh %395 : vector<2x32xf32>
    %cst_57 = arith.constant 1.000000e+00 : f32
    %397 = vector.broadcast %cst_57 : f32 to vector<2x32xf32>
    %398 = arith.subf %397, %391 : vector<2x32xf32>
    %399 = arith.mulf %398, %396 : vector<2x32xf32>
    %400 = arith.mulf %391, %353 : vector<2x32xf32>
    %401 = arith.addf %399, %400 : vector<2x32xf32>
    %402 = vector.broadcast %8 : vector<1x32xf32> to vector<2x32xf32>
    %403 = arith.mulf %401, %402 : vector<2x32xf32>
    %cst_58 = arith.constant dense<0.000000e+00> : vector<2xf32>
    %404 = vector.multi_reduction <add>, %403, %cst_58 [1] : vector<2x32xf32> to vector<2xf32>
    %405 = vector.shape_cast %404 : vector<2xf32> to vector<2x1xf32>
    %406 = vector.broadcast %9 : vector<1x1xf32> to vector<2x1xf32>
    %407 = arith.addf %405, %406 : vector<2x1xf32>
    %c0_59 = arith.constant 0 : index
    %c0_60 = arith.constant 0 : index
    %408 = vector.load %arg5[%c0_59, %c0_60] : memref<2x1xf32, #tpu.memory_space<vmem>>, vector<2x1xf32>
    tpu.vector_store %arg5[%c0_59, %c0_60], %407 {strides = array<i32>} : memref<2x1xf32, #tpu.memory_space<vmem>>, vector<2x1xf32>,
    return
  }
}

</mosaic_0001>

<bundles_post_ra>
// kernel: tpu_custom_call.1
= control target key start
LH: loop header
LB: loop body
LE: loop exit
PB: predicated region body
PF: predicated region fallthrough
CT: control target
= control target key end

     0   :  { %10 = vsyncpa [#allocation3], 0  ;;  %s1705_s0 = inlined_call_operand.vmem [shape: f32[16,1], index: 0, kind: input, shape index: {}]   ;;  %s1706_s1 = inlined_call_operand.hbm [shape: f32[3,96], index: 1, kind: input, shape index: {}]   ;;  %s1707_s2 = inlined_call_operand.vmem [shape: bf16[32,96], index: 2, kind: input, shape index: {}]   ;;  %s1708_s3 = inlined_call_operand.hbm [shape: bf16[64,128], index: 3, kind: input, shape index: {}]   ;;  %s1709_s4 = inlined_call_operand.vmem [shape: f32[2,128], index: 4, kind: input, shape index: {}]   ;;  %s1710_s5 = inlined_call_operand.vmem [shape: f32[2,1], index: 5, kind: output, shape index: {}]  }
   0x1   :  { %s19_s20 = sshll.u32 %s1706_s1, 4  ;;  %s20_s20 = int_to_ptr.hbm [resolvable:$true] %s19_s20 }
   0x2   :  { %11 = vsyncpa [#allocation5], 0  ;;  %s1377_s21 = smov [#allocation2]   ;;  %s31_s25 = sshll.u32 %s1708_s3, 4  ;;  %s32_s25 = int_to_ptr.hbm [resolvable:$true] %s31_s25 }
   0x3   :  { %s21_s22 = sshll.u32 %s1377_s21, 4  ;;  %s1378_s26 = smov [#allocation4]   ;;  %s22_s22 = int_to_ptr.vmem [resolvable:$true] %s21_s22 }
   0x4   :  { %24 = dma.hbm_to_vmem [thread:$0]  %s20_s20, 64, %s22_s22, [#allocation3]  }
   0x5   :  { %s33_s27 = sshll.u32 %s1378_s26, 4  ;;  %s1379_s28 = smov 64   ;;  %s34_s27 = int_to_ptr.vmem [resolvable:$true] %s33_s27 }
   0x6   :  { %s1380_s29 = smov 4  }
   0x7   :  { %39 = dma.hbm_to_vmem [thread:$0]  %s32_s25, 512, %s34_s27, [#allocation5], %s1379_s28, %s1379_s28, %s1380_s29  }
   0x8   :  { %1373 = dma.done.wait [#allocation3], 64  }
   0x9   :  { %1374 = vsyncadd [#allocation3], 4294967232 }
   0xa   :  { %1375 = dma.done.wait [#allocation5], 512  }
   0xb   :  { %1376 = vsyncadd [#allocation5], 4294966784  ;;  %v1381_v0 = vmov 0   ;;  %v1425_v1 = vld [vmem:[%s1707_s2 + $0x8] sm:$0xff]  ;;  %v65_v2 = vld [vmem:[%s1705_s0] sm:$0xff]  ;;  %vm96_vm4 = vcmask 261120  }
   0xc   :  { %1227 = vset.pattern.permute.xlu0 %v1381_v0  ;;  %106 = vmatpush.bf16.msra.mxu0 %v1425_v1  ;;  %v1434_v3 = vld [vmem:[%s1707_s2] sm:$0xff]  ;;  %s1382_s2 = smov 96   ;;  %v1472_v40 = vld [vmem:[#allocation4 + $0x10] sm:$0xff]  ;;  %v1477_v41 = vld [vmem:[#allocation4 + $0x8] sm:$0xff]  ;;  %vm183_vm5 = vcmask 523264   ;;  %s1383_s11 = smov 32  }
   0xd   :  { %69 = vperm.xlu0 %1227, %v65_v2   ;;  %251 = vmatpush.bf16.msra.mxu2 %v1425_v1  ;;  %v1443_v4 = vld [vmem:[#allocation2] sm:$0x7]  ;;  %v1484_v42 = vld [vmem:[#allocation4] sm:$0xff] }
   0xe   :  { %v1446_v5 = vperm.slane %v1443_v4, 2  ;;  %v77_v9 = vperm.slane %v1443_v4, 0  ;;  %v80_v12 = vperm.slane %v1443_v4, 1  ;;  %v1469_v39 = vld [vmem:[#allocation4 + $0x18] sm:$0xff] }
   0xf   :  { %191 = vmatpush.bf16.msra.mxu1 %v1469_v39  ;;  %319 = vmatpush.bf16.msra.mxu3 %v1469_v39  ;;  %v64_v53 = vld [vmem:[%s1709_s4] sm:$0x3] }
  0x10   :  { %107 = vmatpush.bf16.msra.mxu0 %v1434_v3  ;;  %v1510_v56 = vperm.slane %v64_v53, 0 }
  0x11   :  { %252 = vmatpush.bf16.msra.mxu2 %v1434_v3 }
  0x13   :  { %108 = vmatmul.bf16.vlgmr.msra.gmra.mxu0 %v1381_v0  ;;  %192 = vmatpush.bf16.msra.mxu1 %v1472_v40 }
  0x14   :  { %380 = vmatpush.bf16.msrb.mxu0 %v1425_v1  ;;  %320 = vmatpush.bf16.msra.mxu3 %v1472_v40 }
  0x15   :  { %448 = vmatpush.bf16.msrb.mxu2 %v1469_v39 }
  0x17   :  { %193 = vmatpush.bf16.msra.mxu1 %v1477_v41 }
  0x18   :  { %381 = vmatpush.bf16.msrb.mxu0 %v1434_v3  ;;  %321 = vmatpush.bf16.msra.mxu3 %v1477_v41 }
  0x19   :  { %449 = vmatpush.bf16.msrb.mxu2 %v1472_v40 }
  0x1b   :  { %194 = vmatpush.bf16.msra.mxu1 %v1484_v42 }
  0x1c   :  { %638 = vmatpush.bf16.msra.mxu0 %v1425_v1  ;;  %322 = vmatpush.bf16.msra.mxu3 %v1484_v42 }
  0x1d   :  { %450 = vmatpush.bf16.msrb.mxu2 %v1477_v41 }
  0x1f   :  { %509 = vmatpush.bf16.msrb.mxu1 %v1425_v1 }
  0x20   :  { %639 = vmatpush.bf16.msra.mxu0 %v1434_v3  ;;  %577 = vmatpush.bf16.msrb.mxu3 %v1469_v39 }
  0x21   :  { %451 = vmatpush.bf16.msrb.mxu2 %v1484_v42 }
  0x23   :  { %510 = vmatpush.bf16.msrb.mxu1 %v1434_v3 }
  0x24   :  { %578 = vmatpush.bf16.msrb.mxu3 %v1472_v40 }
  0x28   :  { %579 = vmatpush.bf16.msrb.mxu3 %v1477_v41 }
  0x2c   :  { %580 = vmatpush.bf16.msrb.mxu3 %v1484_v42 }
  0x7f   :  { %v70_v10 = vpop.permute.xlu0 %69 }
  0x80   :  { %v78_v11 = vmul.f32 %v77_v9, %v70_v10 }
  0x82   :  { %v1456_v13 = vadd.f32 %v80_v12, %v78_v11 }
  0x90   :  { %v109_v6 = vpop.f32.mrf.mxu0 }
  0x91   :  { %v110_v7 = vadd.f32 %v109_v6, %v1446_v5 }
  0x93   :  { %134 = vrot.lane.b32.xlu0 %v110_v7, %s1379_s28  ;;  %v113_v14 = vadd.f32 %v110_v7, %v1456_v13 }
  0x95   :  { %v1167_v15 = vmul.f32 -1.442695, %v113_v14 }
  0x97   :  { %1228 = vpow2.f32 %v1167_v15 }
  0x98   :  { %v111_v8 = vpop.f32.mrf.mxu0 }
  0x9d   :  { %v1229_v16 = vpop.eup %1228 }
  0x9e   :  { %v117_v17 = vadd.f32 1.0, %v1229_v16 }
  0xa0   :  { %1230 = vrcp.f32 %v117_v17  ;;  %v129_v23 = vand.u32 2147483648, %v117_v17  ;;  %vm123_vm1 = vweird.f32 %v117_v17  ;;  %v127_v24 = vand.u32 2147483647, %v117_v17 }
  0xa2   :  { %v130_v26 = vor.u32 1.1754944e-38, %v129_v23  ;;  %vm128_vm3 = vcmp.eq.f32.partialorder %v127_v24, 8.507059e+37 }
  0xa6   :  { %v1231_v18 = vpop.eup %1230 }
  0xa7   :  { %v119_v19 = vmul.f32 %v1231_v18, %v117_v17  ;;  %vm124_vm0 = vweird.f32 %v1231_v18 }
  0xa8   :  { %vm125_vm2 = vmor %vm123_vm1, %vm124_vm0 }
  0xa9   :  { %v120_v20 = vsub.f32 1.0, %v119_v19 }
  0xab   :  { %v121_v21 = vmul.f32 %v1231_v18, %v120_v20 }
  0xad   :  { %v122_v22 = vadd.f32 %v1231_v18, %v121_v21 }
  0xaf   :  { %v126_v25 = vsel %vm125_vm2, %v1231_v18, %v122_v22 }
  0xb0   :  { %v131_v28 = vsel %vm128_vm3, %v130_v26, %v126_v25 }
  0xb1   :  { %v144_v33 = vsub.f32 1.0, %v131_v28  ;;  %v150_v35 = vmul.f32 0.0, %v131_v28 }
 0x105   :  { %v135_v27 = vpop.permute.xlu0 %134 }
 0x106   :  { %v137_v29 = vmul.f32 %v135_v27, %v131_v28 }
 0x108   :  { %139 = vrot.lane.b32.xlu1 %v137_v29, %s1379_s28 }
 0x17a   :  { %v140_v30 = vpop.permute.xlu1 %139 }
 0x17b   :  { %v142_v31 = vadd.f32 %v140_v30, %v1456_v13 }
 0x17d   :  { %1232 = vtanh.f32 %v142_v31 }
 0x183   :  { %v1233_v32 = vpop.eup %1232 }
 0x184   :  { %146 = vrot.lane.b32.xlu1 %v1233_v32, %s1382_s2 }
 0x1f6   :  { %v147_v34 = vpop.permute.xlu1 %146 }
 0x1f7   :  { %v149_v36 = vmul.f32 %v147_v34, %v144_v33 }
 0x1f9   :  { %v1462_v37 = vadd.f32 %v150_v35, %v149_v36 }
 0x1fb   :  { %153 = vrot.lane.b32.xlu1 %v1462_v37, %s1382_s2  ;;  %v238_v38 = vpack.c.bf16 %v1462_v37, %v1462_v37  ;;  %v297_v10 = vrot.slane %v1462_v37, 6 }
 0x1fd   :  { %240 = vrot.lane.b32.xlu2 %v238_v38, %s1382_s2 }
 0x257   :  { %v241_v43 = vpop.permute.xlu2 %240 }
 0x258   :  { %1186 = vmatmul.msk.bf16.vlgmr.msra.gmra.mxu2 %vm96_vm4, %v241_v43 }
 0x259   :  { %699 = vmatpush.bf16.msra.mxu2 %v1469_v39 }
 0x25d   :  { %700 = vmatpush.bf16.msra.mxu2 %v1472_v40 }
 0x261   :  { %701 = vmatpush.bf16.msra.mxu2 %v1477_v41 }
 0x265   :  { %702 = vmatpush.bf16.msra.mxu2 %v1484_v42 }
 0x26d   :  { %v154_v44 = vpop.permute.xlu1 %153 }
 0x26e   :  { %v156_v45 = vsel %vm96_vm4, %v154_v44, 0.0 }
 0x26f   :  { %v157_v46 = vpack.c.bf16 %v156_v45, %v156_v45 }
 0x271   :  { %1184 = vmatmul.msk.bf16.vlgmr.msra.gmra.mxu1 %vm183_vm5, %v157_v46 }
 0x272   :  { %759 = vmatpush.bf16.msra.mxu1 %v1425_v1 }
 0x276   :  { %760 = vmatpush.bf16.msra.mxu1 %v1434_v3 }
 0x2db   :  { %v254_v47 = vpop.f32.mrf.mxu2 }
 0x2dc   :  { %v255_v48 = vadd.f32 %v254_v47, %v1446_v5 }
 0x2de   :  { %v259_v49 = vrot.slane %v255_v48, 6 }
 0x2e0   :  { %v261_v50 = vadd.f32 %v259_v49, %v1456_v13  ;;  %281 = vrot.lane.b32.xlu2 %v259_v49, %s1379_s28 }
 0x2e2   :  { %v1187_v51 = vmul.f32 -1.442695, %v261_v50 }
 0x2e3   :  { %v256_v52 = vpop.f32.mrf.mxu2 }
 0x2e4   :  { %1234 = vpow2.f32 %v1187_v51 }
 0x2ea   :  { %v1235_v54 = vpop.eup %1234 }
 0x2eb   :  { %v265_v55 = vadd.f32 1.0, %v1235_v54 }
 0x2ed   :  { %1236 = vrcp.f32 %v265_v55  ;;  %v277_v63 = vand.u32 2147483648, %v265_v55  ;;  %v275_v2 = vand.u32 2147483647, %v265_v55  ;;  %vm271_vm7 = vweird.f32 %v265_v55 }
 0x2ee   :  { %v196_v57 = vpop.f32.mrf.mxu1 }
 0x2ef   :  { %v197_v58 = vadd.f32 %v196_v57, %v1510_v56  ;;  %v278_v7 = vor.u32 1.1754944e-38, %v277_v63  ;;  %vm276_vm9 = vcmp.eq.f32.partialorder %v275_v2, 8.507059e+37 }
 0x2f1   :  { %220 = vrot.lane.b32.xlu1 %v197_v58, %s1383_s11  ;;  %v1185_v17 = vmul.f32 -1.442695, %v197_v58 }
 0x2f3   :  { %v1237_v59 = vpop.eup %1236  ;;  %1238 = vpow2.f32 %v1185_v17 }
 0x2f4   :  { %v267_v60 = vmul.f32 %v1237_v59, %v265_v55  ;;  %vm272_vm6 = vweird.f32 %v1237_v59 }
 0x2f5   :  { %vm273_vm8 = vmor %vm271_vm7, %vm272_vm6 }
 0x2f6   :  { %v198_v61 = vpop.f32.mrf.mxu1  ;;  %v268_v62 = vsub.f32 1.0, %v267_v60 }
 0x2f8   :  { %v269_v0 = vmul.f32 %v1237_v59, %v268_v62 }
 0x2f9   :  { %v1239_v18 = vpop.eup %1238 }
 0x2fa   :  { %v270_v6 = vadd.f32 %v1237_v59, %v269_v0  ;;  %v203_v19 = vadd.f32 1.0, %v1239_v18 }
 0x2fc   :  { %v274_v8 = vsel %vm273_vm8, %v1237_v59, %v270_v6  ;;  %1240 = vrcp.f32 %v203_v19  ;;  %v215_v28 = vand.u32 2147483648, %v203_v19  ;;  %vm209_vm11 = vweird.f32 %v203_v19 }
 0x2fd   :  { %v279_v11 = vsel %vm276_vm9, %v278_v7, %v274_v8  ;;  %v213_v29 = vand.u32 2147483647, %v203_v19 }
 0x2fe   :  { %v299_v14 = vmul.f32 %v297_v10, %v279_v11  ;;  %v216_v32 = vor.u32 1.1754944e-38, %v215_v28  ;;  %v291_v35 = vsub.f32 1.0, %v279_v11 }
 0x2ff   :  { %vm214_vm13 = vcmp.eq.f32.partialorder %v213_v29, 8.507059e+37 }
 0x302   :  { %v1241_v20 = vpop.eup %1240 }
 0x303   :  { %v205_v21 = vmul.f32 %v1241_v20, %v203_v19  ;;  %vm210_vm10 = vweird.f32 %v1241_v20 }
 0x304   :  { %vm211_vm12 = vmor %vm209_vm11, %vm210_vm10 }
 0x305   :  { %v206_v22 = vsub.f32 1.0, %v205_v21 }
 0x307   :  { %v207_v25 = vmul.f32 %v1241_v20, %v206_v22 }
 0x309   :  { %v208_v26 = vadd.f32 %v1241_v20, %v207_v25 }
 0x30b   :  { %v212_v30 = vsel %vm211_vm12, %v1241_v20, %v208_v26 }
 0x30c   :  { %v217_v33 = vsel %vm214_vm13, %v216_v32, %v212_v30 }
 0x30d   :  { %v230_v49 = vsub.f32 1.0, %v217_v33  ;;  %v236_v51 = vmul.f32 0.0, %v217_v33 }
 0x33a   :  { %v282_v15 = vpop.permute.xlu2 %281 }
 0x33b   :  { %v284_v16 = vmul.f32 %v282_v15, %v279_v11 }
 0x33d   :  { %286 = vrot.lane.b32.xlu0 %v284_v16, %s1379_s28 }
 0x363   :  { %v221_v31 = vpop.permute.xlu1 %220 }
 0x364   :  { %v223_v34 = vmul.f32 %v221_v31, %v217_v33 }
 0x3af   :  { %v287_v23 = vpop.permute.xlu0 %286 }
 0x3b0   :  { %v289_v24 = vadd.f32 %v287_v23, %v1456_v13 }
 0x3b2   :  { %1242 = vtanh.f32 %v289_v24 }
 0x3b8   :  { %v1243_v27 = vpop.eup %1242 }
 0x3b9   :  { %293 = vrot.lane.b32.xlu2 %v1243_v27, %s1382_s2 }
 0x3c1   :  { %225 = vrot.lane.b32.xlu2 %v223_v34, %s1379_s28 }
 0x413   :  { %v294_v36 = vpop.permute.xlu2 %293 }
 0x414   :  { %v296_v37 = vmul.f32 %v294_v36, %v291_v35 }
 0x416   :  { %v1519_v38 = vadd.f32 %v299_v14, %v296_v37 }
 0x418   :  { %302 = vrot.lane.b32.xlu2 %v1519_v38, %s1382_s2  ;;  %v366_v43 = vpack.c.bf16 %v1519_v38, %v1519_v38 }
 0x41a   :  { %v368_v44 = vrot.slane %v366_v43, 1 }
 0x41b   :  { %v226_v45 = vpop.permute.xlu2 %225 }
 0x41c   :  { %v228_v46 = vadd.f32 %v226_v45, %v197_v58  ;;  %369 = vrot.lane.b32.xlu0 %v368_v44, %s1382_s2 }
 0x41e   :  { %1244 = vtanh.f32 %v228_v46 }
 0x424   :  { %v1245_v47 = vpop.eup %1244 }
 0x425   :  { %232 = vrot.lane.b32.xlu1 %v1245_v47, %s1382_s2 }
 0x472   :  { %v303_v55 = vpop.permute.xlu2 %302 }
 0x48e   :  { %v370_v48 = vpop.permute.xlu0 %369 }
 0x48f   :  { %1190 = vmatmul.msk.bf16.vlgmr.msrb.gmra.mxu0 %vm96_vm4, %v370_v48 }
 0x490   :  { %888 = vmatpush.bf16.msrb.mxu0 %v1425_v1 }
 0x494   :  { %889 = vmatpush.bf16.msrb.mxu0 %v1434_v3 }
 0x497   :  { %v233_v50 = vpop.permute.xlu1 %232 }
 0x498   :  { %v235_v52 = vmul.f32 %v233_v50, %v230_v49  ;;  %v426_v50 = vrot.slane %v1519_v38, 6 }
 0x49a   :  { %v1530_v53 = vadd.f32 %v236_v51, %v235_v52 }
 0x49c   :  { %v306_v54 = vrot.slane %v1530_v53, 6 }
 0x49e   :  { %v308_v57 = vsel %vm96_vm4, %v303_v55, %v306_v54 }
 0x49f   :  { %v309_v58 = vpack.c.bf16 %v308_v57, %v308_v57 }
 0x4a1   :  { %v311_v59 = vrot.slane %v309_v58, 1 }
 0x4a3   :  { %1188 = vmatmul.msk.bf16.vlgmr.msra.gmra.mxu3 %vm183_vm5, %v311_v59 }
 0x4a4   :  { %827 = vmatpush.bf16.msra.mxu3 %v1469_v39 }
 0x4a8   :  { %828 = vmatpush.bf16.msra.mxu3 %v1472_v40 }
 0x4ac   :  { %829 = vmatpush.bf16.msra.mxu3 %v1477_v41 }
 0x4b0   :  { %830 = vmatpush.bf16.msra.mxu3 %v1484_v42 }
 0x50c   :  { %v383_v60 = vpop.f32.mrf.mxu0 }
 0x50d   :  { %v384_v61 = vadd.f32 %v383_v60, %v1446_v5 }
 0x50f   :  { %v388_v62 = vrot.slane %v384_v61, 4 }
 0x511   :  { %410 = vrot.lane.b32.xlu0 %v388_v62, %s1379_s28  ;;  %v390_v6 = vadd.f32 %v388_v62, %v1456_v13 }
 0x513   :  { %v1191_v7 = vmul.f32 -1.442695, %v390_v6 }
 0x514   :  { %v385_v63 = vpop.f32.mrf.mxu0 }
 0x515   :  { %1246 = vpow2.f32 %v1191_v7 }
 0x51b   :  { %v1247_v8 = vpop.eup %1246 }
 0x51c   :  { %v394_v10 = vadd.f32 1.0, %v1247_v8 }
 0x51e   :  { %1248 = vrcp.f32 %v394_v10  ;;  %v406_v18 = vand.u32 2147483648, %v394_v10  ;;  %vm400_vm15 = vweird.f32 %v394_v10  ;;  %v404_v19 = vand.u32 2147483647, %v394_v10 }
 0x520   :  { %v407_v21 = vor.u32 1.1754944e-38, %v406_v18  ;;  %vm405_vm1 = vcmp.eq.f32.partialorder %v404_v19, 8.507059e+37 }
 0x524   :  { %v1249_v11 = vpop.eup %1248 }
 0x525   :  { %v396_v14 = vmul.f32 %v1249_v11, %v394_v10  ;;  %vm401_vm14 = vweird.f32 %v1249_v11 }
 0x526   :  { %v324_v0 = vpop.f32.mrf.mxu3  ;;  %vm402_vm0 = vmor %vm400_vm15, %vm401_vm14 }
 0x527   :  { %v397_v15 = vsub.f32 1.0, %v396_v14  ;;  %v325_v25 = vadd.f32 %v324_v0, %v1510_v56 }
 0x529   :  { %v398_v16 = vmul.f32 %v1249_v11, %v397_v15  ;;  %v1189_v26 = vmul.f32 -1.442695, %v325_v25 }
 0x52b   :  { %v399_v17 = vadd.f32 %v1249_v11, %v398_v16  ;;  %1250 = vpow2.f32 %v1189_v26 }
 0x52d   :  { %v403_v20 = vsel %vm402_vm0, %v1249_v11, %v399_v17 }
 0x52e   :  { %v326_v2 = vpop.f32.mrf.mxu3  ;;  %v408_v23 = vsel %vm405_vm1, %v407_v21, %v403_v20 }
 0x52f   :  { %v420_v49 = vsub.f32 1.0, %v408_v23  ;;  %v428_v52 = vmul.f32 %v426_v50, %v408_v23 }
 0x531   :  { %v1251_v27 = vpop.eup %1250 }
 0x532   :  { %v331_v28 = vadd.f32 1.0, %v1251_v27 }
 0x534   :  { %1252 = vrcp.f32 %v331_v28  ;;  %v343_v37 = vand.u32 2147483648, %v331_v28  ;;  %vm337_vm3 = vweird.f32 %v331_v28  ;;  %v341_v43 = vand.u32 2147483647, %v331_v28 }
 0x536   :  { %v344_v46 = vor.u32 1.1754944e-38, %v343_v37  ;;  %vm342_vm7 = vcmp.eq.f32.partialorder %v341_v43, 8.507059e+37 }
 0x53a   :  { %v1253_v29 = vpop.eup %1252 }
 0x53b   :  { %v333_v30 = vmul.f32 %v1253_v29, %v331_v28  ;;  %vm338_vm2 = vweird.f32 %v1253_v29 }
 0x53c   :  { %vm339_vm6 = vmor %vm337_vm3, %vm338_vm2 }
 0x53d   :  { %v334_v32 = vsub.f32 1.0, %v333_v30 }
 0x53f   :  { %v335_v34 = vmul.f32 %v1253_v29, %v334_v32 }
 0x541   :  { %v336_v35 = vadd.f32 %v1253_v29, %v335_v34 }
 0x543   :  { %v340_v44 = vsel %vm339_vm6, %v1253_v29, %v336_v35 }
 0x544   :  { %v345_v47 = vsel %vm342_vm7, %v344_v46, %v340_v44 }
 0x545   :  { %v358_v62 = vsub.f32 1.0, %v345_v47  ;;  %v364_v2 = vmul.f32 %v345_v47, %v1530_v53 }
 0x583   :  { %v411_v22 = vpop.permute.xlu0 %410 }
 0x584   :  { %v413_v24 = vmul.f32 %v411_v22, %v408_v23 }
 0x586   :  { %415 = vrot.lane.b32.xlu0 %v413_v24, %s1379_s28 }
 0x58e   :  { %348 = vrot.lane.b32.xlu0 %v325_v25, %s1383_s11 }
 0x5f8   :  { %v416_v31 = vpop.permute.xlu0 %415 }
 0x5f9   :  { %v418_v33 = vadd.f32 %v416_v31, %v1456_v13 }
 0x5fb   :  { %1254 = vtanh.f32 %v418_v33 }
 0x600   :  { %v349_v45 = vpop.permute.xlu0 %348 }
 0x601   :  { %v1255_v36 = vpop.eup %1254  ;;  %v351_v48 = vmul.f32 %v349_v45, %v345_v47 }
 0x602   :  { %422 = vrot.lane.b32.xlu1 %v1255_v36, %s1382_s2 }
 0x60a   :  { %353 = vrot.lane.b32.xlu1 %v351_v48, %s1379_s28 }
 0x674   :  { %v423_v51 = vpop.permute.xlu1 %422 }
 0x675   :  { %v425_v54 = vmul.f32 %v423_v51, %v420_v49 }
 0x677   :  { %v1549_v55 = vadd.f32 %v428_v52, %v425_v54 }
 0x679   :  { %431 = vrot.lane.b32.xlu0 %v1549_v55, %s1382_s2  ;;  %v495_v57 = vpack.c.bf16 %v1549_v55, %v1549_v55 }
 0x67b   :  { %v497_v58 = vrot.slane %v495_v57, 2 }
 0x67c   :  { %v354_v59 = vpop.permute.xlu1 %353 }
 0x67d   :  { %v356_v60 = vadd.f32 %v354_v59, %v325_v25  ;;  %498 = vrot.lane.b32.xlu2 %v497_v58, %s1382_s2 }
 0x67f   :  { %1256 = vtanh.f32 %v356_v60 }
 0x685   :  { %v1257_v61 = vpop.eup %1256 }
 0x686   :  { %360 = vrot.lane.b32.xlu2 %v1257_v61, %s1382_s2 }
 0x6d7   :  { %v499_v38 = vpop.permute.xlu2 %498 }
 0x6d8   :  { %1194 = vmatmul.msk.bf16.vlgmr.msrb.gmra.mxu1 %vm96_vm4, %v499_v38  ;;  %v555_v38 = vrot.slane %v1549_v55, 6 }
 0x6d9   :  { %1017 = vmatpush.bf16.msrb.mxu1 %v1425_v1 }
 0x6dd   :  { %1018 = vmatpush.bf16.msrb.mxu1 %v1434_v3 }
 0x6e0   :  { %v361_v63 = vpop.permute.xlu2 %360 }
 0x6e1   :  { %v363_v0 = vmul.f32 %v361_v63, %v358_v62 }
 0x6e3   :  { %v1561_v6 = vadd.f32 %v364_v2, %v363_v0 }
 0x6e5   :  { %v435_v7 = vrot.slane %v1561_v6, 4 }
 0x6eb   :  { %v432_v8 = vpop.permute.xlu0 %431 }
 0x6ec   :  { %v437_v10 = vsel %vm96_vm4, %v432_v8, %v435_v7 }
 0x6ed   :  { %v438_v11 = vpack.c.bf16 %v437_v10, %v437_v10 }
 0x6ef   :  { %v440_v14 = vrot.slane %v438_v11, 2 }
 0x6f1   :  { %1192 = vmatmul.msk.bf16.vlgmr.msrb.gmra.mxu2 %vm183_vm5, %v440_v14 }
 0x6f2   :  { %956 = vmatpush.bf16.msrb.mxu2 %v1469_v39 }
 0x6f6   :  { %957 = vmatpush.bf16.msrb.mxu2 %v1472_v40 }
 0x6fa   :  { %958 = vmatpush.bf16.msrb.mxu2 %v1477_v41 }
 0x6fe   :  { %959 = vmatpush.bf16.msrb.mxu2 %v1484_v42 }
 0x755   :  { %v512_v1 = vpop.f32.mrf.mxu1 }
 0x756   :  { %v513_v3 = vadd.f32 %v512_v1, %v1446_v5 }
 0x758   :  { %v517_v53 = vrot.slane %v513_v3, 2 }
 0x75a   :  { %539 = vrot.lane.b32.xlu1 %v517_v53, %s1379_s28  ;;  %v519_v18 = vadd.f32 %v517_v53, %v1456_v13 }
 0x75c   :  { %v1195_v19 = vmul.f32 -1.442695, %v519_v18 }
 0x75d   :  { %v514_v15 = vpop.f32.mrf.mxu1 }
 0x75e   :  { %1258 = vpow2.f32 %v1195_v19 }
 0x764   :  { %v1259_v20 = vpop.eup %1258 }
 0x765   :  { %v523_v21 = vadd.f32 1.0, %v1259_v20 }
 0x767   :  { %1260 = vrcp.f32 %v523_v21  ;;  %v535_v27 = vand.u32 2147483648, %v523_v21  ;;  %vm529_vm9 = vweird.f32 %v523_v21  ;;  %v533_v28 = vand.u32 2147483647, %v523_v21 }
 0x769   :  { %v536_v30 = vor.u32 1.1754944e-38, %v535_v27  ;;  %vm534_vm11 = vcmp.eq.f32.partialorder %v533_v28, 8.507059e+37 }
 0x76d   :  { %v1261_v22 = vpop.eup %1260 }
 0x76e   :  { %v525_v23 = vmul.f32 %v1261_v22, %v523_v21  ;;  %vm530_vm8 = vweird.f32 %v1261_v22 }
 0x76f   :  { %vm531_vm10 = vmor %vm529_vm9, %vm530_vm8 }
 0x770   :  { %v526_v24 = vsub.f32 1.0, %v525_v23 }
 0x772   :  { %v527_v25 = vmul.f32 %v1261_v22, %v526_v24 }
 0x774   :  { %v453_v16 = vpop.f32.mrf.mxu2  ;;  %v528_v26 = vadd.f32 %v1261_v22, %v527_v25 }
 0x775   :  { %v454_v34 = vadd.f32 %v453_v16, %v1510_v56 }
 0x776   :  { %v532_v29 = vsel %vm531_vm10, %v1261_v22, %v528_v26 }
 0x777   :  { %v537_v32 = vsel %vm534_vm11, %v536_v30, %v532_v29  ;;  %v1193_v35 = vmul.f32 -1.442695, %v454_v34 }
 0x778   :  { %v549_v61 = vsub.f32 1.0, %v537_v32  ;;  %v557_v63 = vmul.f32 %v555_v38, %v537_v32 }
 0x779   :  { %1262 = vpow2.f32 %v1193_v35 }
 0x77c   :  { %v455_v17 = vpop.f32.mrf.mxu2 }
 0x77f   :  { %v1263_v36 = vpop.eup %1262 }
 0x780   :  { %v460_v37 = vadd.f32 1.0, %v1263_v36 }
 0x782   :  { %1264 = vrcp.f32 %v460_v37  ;;  %v472_v51 = vand.u32 2147483648, %v460_v37  ;;  %vm466_vm13 = vweird.f32 %v460_v37  ;;  %v470_v52 = vand.u32 2147483647, %v460_v37 }
 0x784   :  { %v473_v57 = vor.u32 1.1754944e-38, %v472_v51  ;;  %vm471_vm15 = vcmp.eq.f32.partialorder %v470_v52, 8.507059e+37 }
 0x788   :  { %v1265_v43 = vpop.eup %1264 }
 0x789   :  { %v462_v44 = vmul.f32 %v1265_v43, %v460_v37  ;;  %vm467_vm12 = vweird.f32 %v1265_v43 }
 0x78a   :  { %vm468_vm14 = vmor %vm466_vm13, %vm467_vm12 }
 0x78b   :  { %v463_v46 = vsub.f32 1.0, %v462_v44 }
 0x78d   :  { %v464_v48 = vmul.f32 %v1265_v43, %v463_v46 }
 0x78f   :  { %v465_v49 = vadd.f32 %v1265_v43, %v464_v48 }
 0x791   :  { %v469_v54 = vsel %vm468_vm14, %v1265_v43, %v465_v49 }
 0x792   :  { %v474_v59 = vsel %vm471_vm15, %v473_v57, %v469_v54 }
 0x793   :  { %v487_v1 = vsub.f32 1.0, %v474_v59  ;;  %v493_v53 = vmul.f32 %v474_v59, %v1561_v6 }
 0x7cc   :  { %v540_v31 = vpop.permute.xlu1 %539 }
 0x7cd   :  { %v542_v33 = vmul.f32 %v540_v31, %v537_v32 }
 0x7cf   :  { %544 = vrot.lane.b32.xlu2 %v542_v33, %s1379_s28 }
 0x7d7   :  { %477 = vrot.lane.b32.xlu2 %v454_v34, %s1383_s11 }
 0x829   :  { %v545_v45 = vpop.permute.xlu2 %544 }
 0x82a   :  { %v547_v47 = vadd.f32 %v545_v45, %v1456_v13  ;;  %v66_v13 = vld [vmem:[%s1705_s0 + $0x8] sm:$0xff] }
 0x82c   :  { %1266 = vtanh.f32 %v547_v47 }
 0x831   :  { %v478_v58 = vpop.permute.xlu2 %477 }
 0x832   :  { %v1267_v50 = vpop.eup %1266  ;;  %v480_v60 = vmul.f32 %v478_v58, %v474_v59 }
 0x833   :  { %551 = vrot.lane.b32.xlu0 %v1267_v50, %s1382_s2 }
 0x83b   :  { %482 = vrot.lane.b32.xlu0 %v480_v60, %s1379_s28 }
 0x843   :  { %74 = vperm.xlu0 %1227, %v66_v13  }
 0x8a5   :  { %v552_v62 = vpop.permute.xlu0 %551 }
 0x8a6   :  { %v554_v0 = vmul.f32 %v552_v62, %v549_v61 }
 0x8a8   :  { %v1583_v2 = vadd.f32 %v557_v63, %v554_v0 }
 0x8aa   :  { %560 = vrot.lane.b32.xlu2 %v1583_v2, %s1382_s2  ;;  %v624_v7 = vpack.c.bf16 %v1583_v2, %v1583_v2  ;;  %v682_v0 = vrot.slane %v1583_v2, 6 }
 0x8ac   :  { %v626_v8 = vrot.slane %v624_v7, 3 }
 0x8ad   :  { %v483_v10 = vpop.permute.xlu0 %482 }
 0x8ae   :  { %v485_v11 = vadd.f32 %v483_v10, %v454_v34  ;;  %627 = vrot.lane.b32.xlu1 %v626_v8, %s1382_s2 }
 0x8b0   :  { %1268 = vtanh.f32 %v485_v11 }
 0x8b5   :  { %v75_v26 = vpop.permute.xlu0 %74 }
 0x8b6   :  { %v1269_v14 = vpop.eup %1268  ;;  %v79_v27 = vmul.f32 %v77_v9, %v75_v26 }
 0x8b7   :  { %489 = vrot.lane.b32.xlu1 %v1269_v14, %s1382_s2 }
 0x904   :  { %v561_v18 = vpop.permute.xlu2 %560 }
 0x920   :  { %v628_v55 = vpop.permute.xlu1 %627 }
 0x921   :  { %1198 = vmatmul.msk.bf16.vlgmr.msra.gmra.mxu0 %vm96_vm4, %v628_v55 }
 0x929   :  { %v490_v3 = vpop.permute.xlu1 %489 }
 0x92a   :  { %v492_v15 = vmul.f32 %v490_v3, %v487_v1 }
 0x92c   :  { %v1593_v16 = vadd.f32 %v493_v53, %v492_v15 }
 0x92e   :  { %v564_v17 = vrot.slane %v1593_v16, 2 }
 0x930   :  { %v566_v19 = vsel %vm96_vm4, %v561_v18, %v564_v17 }
 0x931   :  { %v567_v20 = vpack.c.bf16 %v566_v19, %v566_v19 }
 0x933   :  { %v569_v21 = vrot.slane %v567_v20, 3 }
 0x935   :  { %1196 = vmatmul.msk.bf16.vlgmr.msrb.gmra.mxu3 %vm183_vm5, %v569_v21 }
 0x936   :  { %1085 = vmatpush.bf16.msrb.mxu3 %v1469_v39  ;;  %v1608_v39 = vadd.f32 %v80_v12, %v79_v27 }
 0x93a   :  { %1086 = vmatpush.bf16.msrb.mxu3 %v1472_v40 }
 0x93e   :  { %1087 = vmatpush.bf16.msrb.mxu3 %v1477_v41 }
 0x942   :  { %1088 = vmatpush.bf16.msrb.mxu3 %v1484_v42 }
 0x99e   :  { %v641_v6 = vpop.f32.mrf.mxu0 }
 0x99f   :  { %v642_v22 = vadd.f32 %v641_v6, %v1446_v5 }
 0x9a1   :  { %666 = vrot.lane.b32.xlu1 %v642_v22, %s1379_s28  ;;  %v645_v40 = vadd.f32 %v642_v22, %v1608_v39 }
 0x9a3   :  { %v1199_v41 = vmul.f32 -1.442695, %v645_v40 }
 0x9a5   :  { %1270 = vpow2.f32 %v1199_v41 }
 0x9a6   :  { %v643_v23 = vpop.f32.mrf.mxu0 }
 0x9ab   :  { %v1271_v42 = vpop.eup %1270 }
 0x9ac   :  { %v649_v28 = vadd.f32 1.0, %v1271_v42 }
 0x9ae   :  { %1272 = vrcp.f32 %v649_v28  ;;  %v661_v34 = vand.u32 2147483648, %v649_v28  ;;  %vm655_vm1 = vweird.f32 %v649_v28  ;;  %v659_v9 = vand.u32 2147483647, %v649_v28 }
 0x9b0   :  { %v662_v12 = vor.u32 1.1754944e-38, %v661_v34  ;;  %vm660_vm3 = vcmp.eq.f32.partialorder %v659_v9, 8.507059e+37 }
 0x9b4   :  { %v1273_v29 = vpop.eup %1272 }
 0x9b5   :  { %v651_v30 = vmul.f32 %v1273_v29, %v649_v28  ;;  %vm656_vm0 = vweird.f32 %v1273_v29 }
 0x9b6   :  { %vm657_vm2 = vmor %vm655_vm1, %vm656_vm0 }
 0x9b7   :  { %v652_v31 = vsub.f32 1.0, %v651_v30 }
 0x9b8   :  { %v582_v24 = vpop.f32.mrf.mxu3 }
 0x9b9   :  { %v653_v32 = vmul.f32 %v1273_v29, %v652_v31  ;;  %v583_v43 = vadd.f32 %v582_v24, %v1510_v56 }
 0x9bb   :  { %v654_v33 = vadd.f32 %v1273_v29, %v653_v32  ;;  %v1197_v44 = vmul.f32 -1.442695, %v583_v43 }
 0x9bd   :  { %v658_v4 = vsel %vm657_vm2, %v1273_v29, %v654_v33  ;;  %1274 = vpow2.f32 %v1197_v44 }
 0x9be   :  { %v663_v36 = vsel %vm660_vm3, %v662_v12, %v658_v4 }
 0x9bf   :  { %v676_v63 = vsub.f32 1.0, %v663_v36  ;;  %v684_v8 = vmul.f32 %v682_v0, %v663_v36 }
 0x9c0   :  { %v584_v25 = vpop.f32.mrf.mxu3 }
 0x9c3   :  { %v1275_v45 = vpop.eup %1274 }
 0x9c4   :  { %v589_v46 = vadd.f32 1.0, %v1275_v45 }
 0x9c6   :  { %1276 = vrcp.f32 %v589_v46  ;;  %v601_v58 = vand.u32 2147483648, %v589_v46  ;;  %vm595_vm7 = vweird.f32 %v589_v46  ;;  %v599_v59 = vand.u32 2147483647, %v589_v46 }
 0x9c8   :  { %v602_v13 = vor.u32 1.1754944e-38, %v601_v58  ;;  %vm600_vm9 = vcmp.eq.f32.partialorder %v599_v59, 8.507059e+37 }
 0x9cc   :  { %v1277_v47 = vpop.eup %1276 }
 0x9cd   :  { %v591_v48 = vmul.f32 %v1277_v47, %v589_v46  ;;  %vm596_vm6 = vweird.f32 %v1277_v47 }
 0x9ce   :  { %vm597_vm8 = vmor %vm595_vm7, %vm596_vm6 }
 0x9cf   :  { %v592_v50 = vsub.f32 1.0, %v591_v48 }
 0x9d1   :  { %v593_v52 = vmul.f32 %v1277_v47, %v592_v50 }
 0x9d3   :  { %v594_v54 = vadd.f32 %v1277_v47, %v593_v52 }
 0x9d5   :  { %v598_v60 = vsel %vm597_vm8, %v1277_v47, %v594_v54 }
 0x9d6   :  { %v603_v38 = vsel %vm600_vm9, %v602_v13, %v598_v60 }
 0x9d7   :  { %v616_v53 = vsub.f32 1.0, %v603_v38  ;;  %v622_v17 = vmul.f32 %v603_v38, %v1593_v16 }
 0xa13   :  { %v667_v35 = vpop.permute.xlu1 %666 }
 0xa14   :  { %v669_v37 = vmul.f32 %v667_v35, %v663_v36 }
 0xa16   :  { %671 = vrot.lane.b32.xlu2 %v669_v37, %s1379_s28 }
 0xa1e   :  { %606 = vrot.lane.b32.xlu2 %v583_v43, %s1383_s11 }
 0xa70   :  { %v672_v49 = vpop.permute.xlu2 %671 }
 0xa71   :  { %v674_v51 = vadd.f32 %v672_v49, %v1608_v39 }
 0xa73   :  { %1278 = vtanh.f32 %v674_v51 }
 0xa78   :  { %v607_v61 = vpop.permute.xlu2 %606 }
 0xa79   :  { %v1279_v57 = vpop.eup %1278  ;;  %v609_v62 = vmul.f32 %v607_v61, %v603_v38 }
 0xa7a   :  { %678 = vrot.lane.b32.xlu0 %v1279_v57, %s1382_s2 }
 0xa82   :  { %611 = vrot.lane.b32.xlu0 %v609_v62, %s1379_s28 }
 0xaec   :  { %v679_v7 = vpop.permute.xlu0 %678 }
 0xaed   :  { %v681_v10 = vmul.f32 %v679_v7, %v676_v63 }
 0xaef   :  { %v1618_v11 = vadd.f32 %v684_v8, %v681_v10 }
 0xaf1   :  { %687 = vrot.lane.b32.xlu2 %v1618_v11, %s1382_s2  ;;  %v746_v14 = vpack.c.bf16 %v1618_v11, %v1618_v11  ;;  %v805_v63 = vrot.slane %v1618_v11, 6 }
 0xaf3   :  { %748 = vrot.lane.b32.xlu1 %v746_v14, %s1382_s2 }
 0xaf4   :  { %v612_v55 = vpop.permute.xlu0 %611 }
 0xaf5   :  { %v614_v1 = vadd.f32 %v612_v55, %v583_v43 }
 0xaf7   :  { %1280 = vtanh.f32 %v614_v1 }
 0xafd   :  { %v1281_v3 = vpop.eup %1280 }
 0xafe   :  { %618 = vrot.lane.b32.xlu1 %v1281_v3, %s1382_s2 }
 0xb4b   :  { %v688_v20 = vpop.permute.xlu2 %687 }
 0xb65   :  { %v749_v2 = vpop.permute.xlu1 %748 }
 0xb66   :  { %1202 = vmatmul.msk.bf16.vlgmr.msra.gmra.mxu1 %vm96_vm4, %v749_v2 }
 0xb70   :  { %v619_v15 = vpop.permute.xlu1 %618 }
 0xb71   :  { %v621_v18 = vmul.f32 %v619_v15, %v616_v53 }
 0xb73   :  { %v1628_v19 = vadd.f32 %v622_v17, %v621_v18 }
 0xb75   :  { %v690_v21 = vsel %vm96_vm4, %v688_v20, %v1628_v19 }
 0xb76   :  { %v691_v6 = vpack.c.bf16 %v690_v21, %v690_v21 }
 0xb78   :  { %1200 = vmatmul.msk.bf16.vlgmr.msra.gmra.mxu2 %vm183_vm5, %v691_v6 }
 0xbe3   :  { %v762_v22 = vpop.f32.mrf.mxu1 }
 0xbe4   :  { %v763_v23 = vadd.f32 %v762_v22, %v1446_v5 }
 0xbe6   :  { %v767_v24 = vrot.slane %v763_v23, 6 }
 0xbe8   :  { %789 = vrot.lane.b32.xlu0 %v767_v24, %s1379_s28  ;;  %v769_v40 = vadd.f32 %v767_v24, %v1608_v39 }
 0xbea   :  { %v1203_v41 = vmul.f32 -1.442695, %v769_v40 }
 0xbeb   :  { %v764_v25 = vpop.f32.mrf.mxu1 }
 0xbec   :  { %1282 = vpow2.f32 %v1203_v41 }
 0xbf2   :  { %v1283_v42 = vpop.eup %1282 }
 0xbf3   :  { %v773_v28 = vadd.f32 1.0, %v1283_v42 }
 0xbf5   :  { %1284 = vrcp.f32 %v773_v28  ;;  %v785_v34 = vand.u32 2147483648, %v773_v28  ;;  %vm779_vm11 = vweird.f32 %v773_v28  ;;  %v783_v9 = vand.u32 2147483647, %v773_v28 }
 0xbf7   :  { %v786_v12 = vor.u32 1.1754944e-38, %v785_v34  ;;  %vm784_vm13 = vcmp.eq.f32.partialorder %v783_v9, 8.507059e+37 }
 0xbfb   :  { %v704_v26 = vpop.f32.mrf.mxu2  ;;  %v1285_v29 = vpop.eup %1284 }
 0xbfc   :  { %v705_v16 = vadd.f32 %v704_v26, %v1510_v56  ;;  %v775_v30 = vmul.f32 %v1285_v29, %v773_v28  ;;  %vm780_vm10 = vweird.f32 %v1285_v29 }
 0xbfd   :  { %vm781_vm12 = vmor %vm779_vm11, %vm780_vm10 }
 0xbfe   :  { %728 = vrot.lane.b32.xlu0 %v705_v16, %s1383_s11  ;;  %v776_v31 = vsub.f32 1.0, %v775_v30  ;;  %v1201_v43 = vmul.f32 -1.442695, %v705_v16 }
 0xc00   :  { %v777_v32 = vmul.f32 %v1285_v29, %v776_v31  ;;  %1286 = vpow2.f32 %v1201_v43 }
 0xc02   :  { %v778_v33 = vadd.f32 %v1285_v29, %v777_v32 }
 0xc03   :  { %v706_v27 = vpop.f32.mrf.mxu2 }
 0xc04   :  { %v782_v4 = vsel %vm781_vm12, %v1285_v29, %v778_v33 }
 0xc05   :  { %v787_v35 = vsel %vm784_vm13, %v786_v12, %v782_v4 }
 0xc06   :  { %v1287_v44 = vpop.eup %1286  ;;  %v799_v62 = vsub.f32 1.0, %v787_v35  ;;  %v807_v7 = vmul.f32 %v805_v63, %v787_v35 }
 0xc07   :  { %v711_v45 = vadd.f32 1.0, %v1287_v44 }
 0xc09   :  { %1288 = vrcp.f32 %v711_v45  ;;  %v723_v57 = vand.u32 2147483648, %v711_v45  ;;  %vm717_vm15 = vweird.f32 %v711_v45  ;;  %v721_v58 = vand.u32 2147483647, %v711_v45 }
 0xc0b   :  { %v724_v13 = vor.u32 1.1754944e-38, %v723_v57  ;;  %vm722_vm1 = vcmp.eq.f32.partialorder %v721_v58, 8.507059e+37 }
 0xc0f   :  { %v1289_v46 = vpop.eup %1288 }
 0xc10   :  { %v713_v47 = vmul.f32 %v1289_v46, %v711_v45  ;;  %vm718_vm14 = vweird.f32 %v1289_v46 }
 0xc11   :  { %vm719_vm0 = vmor %vm717_vm15, %vm718_vm14 }
 0xc12   :  { %v714_v48 = vsub.f32 1.0, %v713_v47 }
 0xc14   :  { %v715_v51 = vmul.f32 %v1289_v46, %v714_v48 }
 0xc16   :  { %v716_v52 = vadd.f32 %v1289_v46, %v715_v51 }
 0xc18   :  { %v720_v59 = vsel %vm719_vm0, %v1289_v46, %v716_v52 }
 0xc19   :  { %v725_v61 = vsel %vm722_vm1, %v724_v13, %v720_v59 }
 0xc1a   :  { %v738_v11 = vsub.f32 1.0, %v725_v61  ;;  %v744_v17 = vmul.f32 %v725_v61, %v1628_v19 }
 0xc5a   :  { %v790_v36 = vpop.permute.xlu0 %789 }
 0xc5b   :  { %v792_v37 = vmul.f32 %v790_v36, %v787_v35 }
 0xc5d   :  { %794 = vrot.lane.b32.xlu1 %v792_v37, %s1379_s28 }
 0xc70   :  { %v729_v60 = vpop.permute.xlu0 %728 }
 0xc71   :  { %v731_v38 = vmul.f32 %v729_v60, %v725_v61 }
 0xccf   :  { %v795_v49 = vpop.permute.xlu1 %794 }
 0xcd0   :  { %v797_v50 = vadd.f32 %v795_v49, %v1608_v39 }
 0xcd2   :  { %1290 = vtanh.f32 %v797_v50 }
 0xcd8   :  { %v1291_v54 = vpop.eup %1290 }
 0xcd9   :  { %801 = vrot.lane.b32.xlu2 %v1291_v54, %s1382_s2 }
 0xce1   :  { %733 = vrot.lane.b32.xlu2 %v731_v38, %s1379_s28 }
 0xd33   :  { %v802_v0 = vpop.permute.xlu2 %801 }
 0xd34   :  { %v804_v8 = vmul.f32 %v802_v0, %v799_v62 }
 0xd36   :  { %v808_v10 = vadd.f32 %v807_v7, %v804_v8 }
 0xd38   :  { %v874_v14 = vpack.c.bf16 %v808_v10, %v808_v10  ;;  %v934_v36 = vrot.slane %v808_v10, 6 }
 0xd3a   :  { %v876_v55 = vrot.slane %v874_v14, 1 }
 0xd3b   :  { %v734_v1 = vpop.permute.xlu2 %733 }
 0xd3c   :  { %v736_v3 = vadd.f32 %v734_v1, %v705_v16  ;;  %877 = vrot.lane.b32.xlu1 %v876_v55, %s1382_s2 }
 0xd3e   :  { %1292 = vtanh.f32 %v736_v3 }
 0xd44   :  { %v1293_v2 = vpop.eup %1292  ;;  %810 = vrot.lane.b32.xlu1 %v808_v10, %s1382_s2 }
 0xd45   :  { %740 = vrot.lane.b32.xlu0 %v1293_v2, %s1382_s2 }
 0xdae   :  { %v878_v53 = vpop.permute.xlu1 %877 }
 0xdaf   :  { %1206 = vmatmul.msk.bf16.vlgmr.msrb.gmra.mxu0 %vm96_vm4, %v878_v53 }
 0xdb6   :  { %v811_v6 = vpop.permute.xlu1 %810 }
 0xdb7   :  { %v741_v15 = vpop.permute.xlu0 %740 }
 0xdb8   :  { %v743_v18 = vmul.f32 %v741_v15, %v738_v11 }
 0xdba   :  { %v1648_v20 = vadd.f32 %v744_v17, %v743_v18 }
 0xdbc   :  { %v814_v21 = vrot.slane %v1648_v20, 6 }
 0xdbe   :  { %v816_v22 = vsel %vm96_vm4, %v811_v6, %v814_v21 }
 0xdbf   :  { %v817_v23 = vpack.c.bf16 %v816_v22, %v816_v22 }
 0xdc1   :  { %v819_v24 = vrot.slane %v817_v23, 1 }
 0xdc3   :  { %1204 = vmatmul.msk.bf16.vlgmr.msra.gmra.mxu3 %vm183_vm5, %v819_v24 }
 0xe2c   :  { %v891_v25 = vpop.f32.mrf.mxu0 }
 0xe2d   :  { %v892_v26 = vadd.f32 %v891_v25, %v1446_v5 }
 0xe2f   :  { %v896_v16 = vrot.slane %v892_v26, 4 }
 0xe31   :  { %v898_v27 = vadd.f32 %v896_v16, %v1608_v39  ;;  %918 = vrot.lane.b32.xlu2 %v896_v16, %s1379_s28 }
 0xe33   :  { %v1207_v19 = vmul.f32 -1.442695, %v898_v27 }
 0xe34   :  { %v893_v40 = vpop.f32.mrf.mxu0 }
 0xe35   :  { %1294 = vpow2.f32 %v1207_v19 }
 0xe3b   :  { %v1295_v41 = vpop.eup %1294 }
 0xe3c   :  { %v902_v42 = vadd.f32 1.0, %v1295_v41 }
 0xe3e   :  { %1296 = vrcp.f32 %v902_v42  ;;  %v914_v33 = vand.u32 2147483648, %v902_v42  ;;  %v912_v9 = vand.u32 2147483647, %v902_v42  ;;  %vm908_vm3 = vweird.f32 %v902_v42 }
 0xe40   :  { %v915_v12 = vor.u32 1.1754944e-38, %v914_v33  ;;  %vm913_vm7 = vcmp.eq.f32.partialorder %v912_v9, 8.507059e+37 }
 0xe44   :  { %v1297_v28 = vpop.eup %1296 }
 0xe45   :  { %v904_v29 = vmul.f32 %v1297_v28, %v902_v42  ;;  %vm909_vm2 = vweird.f32 %v1297_v28 }
 0xe46   :  { %v832_v30 = vpop.f32.mrf.mxu3  ;;  %vm910_vm6 = vmor %vm908_vm3, %vm909_vm2 }
 0xe47   :  { %v833_v31 = vadd.f32 %v832_v30, %v1510_v56  ;;  %v905_v32 = vsub.f32 1.0, %v904_v29 }
 0xe49   :  { %856 = vrot.lane.b32.xlu1 %v833_v31, %s1383_s11  ;;  %v906_v34 = vmul.f32 %v1297_v28, %v905_v32  ;;  %v1205_v47 = vmul.f32 -1.442695, %v833_v31 }
 0xe4b   :  { %v907_v4 = vadd.f32 %v1297_v28, %v906_v34  ;;  %1298 = vpow2.f32 %v1205_v47 }
 0xe4d   :  { %v911_v35 = vsel %vm910_vm6, %v1297_v28, %v907_v4 }
 0xe4e   :  { %v834_v37 = vpop.f32.mrf.mxu3  ;;  %v916_v43 = vsel %vm913_vm7, %v915_v12, %v911_v35 }
 0xe4f   :  { %v936_v44 = vmul.f32 %v934_v36, %v916_v43  ;;  %v928_v55 = vsub.f32 1.0, %v916_v43 }
 0xe51   :  { %v1299_v48 = vpop.eup %1298 }
 0xe52   :  { %v839_v49 = vadd.f32 1.0, %v1299_v48 }
 0xe54   :  { %1300 = vrcp.f32 %v839_v49  ;;  %v851_v58 = vand.u32 2147483648, %v839_v49  ;;  %vm845_vm9 = vweird.f32 %v839_v49  ;;  %v849_v59 = vand.u32 2147483647, %v839_v49 }
 0xe56   :  { %v852_v13 = vor.u32 1.1754944e-38, %v851_v58  ;;  %vm850_vm11 = vcmp.eq.f32.partialorder %v849_v59, 8.507059e+37 }
 0xe5a   :  { %v1301_v50 = vpop.eup %1300 }
 0xe5b   :  { %v841_v51 = vmul.f32 %v1301_v50, %v839_v49  ;;  %vm846_vm8 = vweird.f32 %v1301_v50 }
 0xe5c   :  { %vm847_vm10 = vmor %vm845_vm9, %vm846_vm8  ;;  %vm1142_vm8 = vcmask 254976   ;;  %vm1151_vm9 = vcmask 1024  }
 0xe5d   :  { %v842_v52 = vsub.f32 1.0, %v841_v51 }
 0xe5f   :  { %v843_v54 = vmul.f32 %v1301_v50, %v842_v52 }
 0xe61   :  { %v844_v57 = vadd.f32 %v1301_v50, %v843_v54 }
 0xe63   :  { %v848_v60 = vsel %vm847_vm10, %v1301_v50, %v844_v57 }
 0xe64   :  { %v853_v38 = vsel %vm850_vm11, %v852_v13, %v848_v60 }
 0xe65   :  { %v866_v17 = vsub.f32 1.0, %v853_v38  ;;  %v872_v21 = vmul.f32 %v853_v38, %v1648_v20 }
 0xe8b   :  { %v919_v45 = vpop.permute.xlu2 %918 }
 0xe8c   :  { %v921_v46 = vmul.f32 %v919_v45, %v916_v43 }
 0xe8e   :  { %923 = vrot.lane.b32.xlu0 %v921_v46, %s1379_s28 }
 0xebb   :  { %v857_v61 = vpop.permute.xlu1 %856 }
 0xebc   :  { %v859_v62 = vmul.f32 %v857_v61, %v853_v38 }
 0xebe   :  { %861 = vrot.lane.b32.xlu0 %v859_v62, %s1379_s28 }
 0xf00   :  { %v924_v63 = vpop.permute.xlu0 %923 }
 0xf01   :  { %v926_v0 = vadd.f32 %v924_v63, %v1608_v39 }
 0xf03   :  { %1302 = vtanh.f32 %v926_v0 }
 0xf09   :  { %v1303_v7 = vpop.eup %1302 }
 0xf0a   :  { %930 = vrot.lane.b32.xlu2 %v1303_v7, %s1382_s2 }
 0xf30   :  { %v862_v8 = vpop.permute.xlu0 %861 }
 0xf31   :  { %v864_v10 = vadd.f32 %v862_v8, %v833_v31 }
 0xf33   :  { %1304 = vtanh.f32 %v864_v10 }
 0xf39   :  { %v1305_v14 = vpop.eup %1304 }
 0xf3a   :  { %868 = vrot.lane.b32.xlu2 %v1305_v14, %s1382_s2 }
 0xf64   :  { %v931_v1 = vpop.permute.xlu2 %930 }
 0xf65   :  { %v933_v3 = vmul.f32 %v931_v1, %v928_v55 }
 0xf67   :  { %v1663_v2 = vadd.f32 %v936_v44, %v933_v3 }
 0xf69   :  { %939 = vrot.lane.b32.xlu0 %v1663_v2, %s1382_s2  ;;  %v1003_v53 = vpack.c.bf16 %v1663_v2, %v1663_v2  ;;  %v1063_v55 = vrot.slane %v1663_v2, 6 }
 0xf6b   :  { %v1005_v11 = vrot.slane %v1003_v53, 2 }
 0xf6d   :  { %1006 = vrot.lane.b32.xlu1 %v1005_v11, %s1382_s2 }
 0xf94   :  { %v869_v15 = vpop.permute.xlu2 %868 }
 0xf95   :  { %v871_v18 = vmul.f32 %v869_v15, %v866_v17 }
 0xf97   :  { %v1671_v6 = vadd.f32 %v872_v21, %v871_v18 }
 0xf99   :  { %v943_v22 = vrot.slane %v1671_v6, 4 }
 0xfdb   :  { %v940_v23 = vpop.permute.xlu0 %939 }
 0xfdc   :  { %v945_v24 = vsel %vm96_vm4, %v940_v23, %v943_v22 }
 0xfdd   :  { %v946_v25 = vpack.c.bf16 %v945_v24, %v945_v24 }
 0xfdf   :  { %v948_v26 = vrot.slane %v946_v25, 2  ;;  %v1007_v16 = vpop.permute.xlu1 %1006 }
 0xfe0   :  { %1210 = vmatmul.msk.bf16.vlgmr.msrb.gmra.mxu1 %vm96_vm4, %v1007_v16 }
 0xfe1   :  { %1208 = vmatmul.msk.bf16.vlgmr.msrb.gmra.mxu2 %vm183_vm5, %v948_v26 }
0x105d   :  { %v1020_v27 = vpop.f32.mrf.mxu1 }
0x105e   :  { %v1021_v19 = vadd.f32 %v1020_v27, %v1446_v5 }
0x1060   :  { %v1025_v40 = vrot.slane %v1021_v19, 2 }
0x1062   :  { %1047 = vrot.lane.b32.xlu1 %v1025_v40, %s1379_s28  ;;  %v1027_v32 = vadd.f32 %v1025_v40, %v1608_v39 }
0x1064   :  { %v961_v20 = vpop.f32.mrf.mxu2  ;;  %v1211_v33 = vmul.f32 -1.442695, %v1027_v32 }
0x1065   :  { %v962_v41 = vadd.f32 %v961_v20, %v1510_v56  ;;  %v1022_v42 = vpop.f32.mrf.mxu1 }
0x1067   :  { %985 = vrot.lane.b32.xlu2 %v962_v41, %s1383_s11  ;;  %v1209_v29 = vmul.f32 -1.442695, %v962_v41 }
0x1069   :  { %1306 = vpow2.f32 %v1209_v29 }
0x106c   :  { %v963_v28 = vpop.f32.mrf.mxu2 }
0x106f   :  { %v1307_v30 = vpop.eup %1306 }
0x1070   :  { %v968_v31 = vadd.f32 1.0, %v1307_v30 }
0x1072   :  { %1308 = vrcp.f32 %v968_v31  ;;  %v980_v37 = vand.u32 2147483648, %v968_v31  ;;  %vm974_vm13 = vweird.f32 %v968_v31  ;;  %v978_v43 = vand.u32 2147483647, %v968_v31 }
0x1073   :  { %1310 = vpow2.f32 %v1211_v33 }
0x1074   :  { %v981_v46 = vor.u32 1.1754944e-38, %v980_v37  ;;  %vm979_vm15 = vcmp.eq.f32.partialorder %v978_v43, 8.507059e+37 }
0x1078   :  { %v1309_v34 = vpop.eup %1308 }
0x1079   :  { %v970_v5 = vmul.f32 %v1309_v34, %v968_v31  ;;  %v1311_v9 = vpop.eup %1310  ;;  %vm975_vm12 = vweird.f32 %v1309_v34 }
0x107a   :  { %v1031_v12 = vadd.f32 1.0, %v1311_v9  ;;  %vm976_vm14 = vmor %vm974_vm13, %vm975_vm12  ;;  %v1324_v9 = vld [vmem:[%s1709_s4] sm:$0x3] }
0x107b   :  { %v971_v4 = vsub.f32 1.0, %v970_v5 }
0x107c   :  { %1312 = vrcp.f32 %v1031_v12  ;;  %v1043_v57 = vand.u32 2147483648, %v1031_v12  ;;  %vm1037_vm1 = vweird.f32 %v1031_v12  ;;  %v1041_v58 = vand.u32 2147483647, %v1031_v12 }
0x107d   :  { %v972_v35 = vmul.f32 %v1309_v34, %v971_v4  ;;  %v1132_v4 = vperm.slane %v1324_v9, 1 }
0x107e   :  { %v1044_v60 = vor.u32 1.1754944e-38, %v1043_v57  ;;  %vm1042_vm3 = vcmp.eq.f32.partialorder %v1041_v58, 8.507059e+37 }
0x107f   :  { %v973_v36 = vadd.f32 %v1309_v34, %v972_v35 }
0x1081   :  { %v977_v45 = vsel %vm976_vm14, %v1309_v34, %v973_v36 }
0x1082   :  { %v1313_v44 = vpop.eup %1312  ;;  %v982_v48 = vsel %vm979_vm15, %v981_v46, %v977_v45 }
0x1083   :  { %v1033_v49 = vmul.f32 %v1313_v44, %v1031_v12  ;;  %vm1038_vm0 = vweird.f32 %v1313_v44  ;;  %v995_v17 = vsub.f32 1.0, %v982_v48  ;;  %v1001_v21 = vmul.f32 %v982_v48, %v1671_v6 }
0x1084   :  { %vm1039_vm2 = vmor %vm1037_vm1, %vm1038_vm0 }
0x1085   :  { %v1034_v51 = vsub.f32 1.0, %v1033_v49 }
0x1087   :  { %v1035_v52 = vmul.f32 %v1313_v44, %v1034_v51 }
0x1089   :  { %v1036_v54 = vadd.f32 %v1313_v44, %v1035_v52 }
0x108b   :  { %v1040_v59 = vsel %vm1039_vm2, %v1313_v44, %v1036_v54 }
0x108c   :  { %v1045_v61 = vsel %vm1042_vm3, %v1044_v60, %v1040_v59 }
0x108d   :  { %v1057_v14 = vsub.f32 1.0, %v1045_v61  ;;  %v1065_v3 = vmul.f32 %v1063_v55, %v1045_v61 }
0x10c1   :  { %v986_v47 = vpop.permute.xlu2 %985 }
0x10c2   :  { %v988_v50 = vmul.f32 %v986_v47, %v982_v48 }
0x10c4   :  { %990 = vrot.lane.b32.xlu1 %v988_v50, %s1379_s28 }
0x10d4   :  { %v1048_v13 = vpop.permute.xlu1 %1047 }
0x10d5   :  { %v1050_v38 = vmul.f32 %v1048_v13, %v1045_v61 }
0x10d7   :  { %1052 = vrot.lane.b32.xlu0 %v1050_v38, %s1379_s28 }
0x1136   :  { %v991_v62 = vpop.permute.xlu1 %990 }
0x1137   :  { %v993_v63 = vadd.f32 %v991_v62, %v962_v41 }
0x1139   :  { %1314 = vtanh.f32 %v993_v63 }
0x113f   :  { %v1315_v0 = vpop.eup %1314 }
0x1140   :  { %997 = vrot.lane.b32.xlu0 %v1315_v0, %s1382_s2 }
0x1149   :  { %v1053_v7 = vpop.permute.xlu0 %1052 }
0x114a   :  { %v1055_v8 = vadd.f32 %v1053_v7, %v1608_v39 }
0x114c   :  { %1316 = vtanh.f32 %v1055_v8 }
0x1152   :  { %v1317_v10 = vpop.eup %1316 }
0x1153   :  { %1059 = vrot.lane.b32.xlu2 %v1317_v10, %s1382_s2 }
0x11ad   :  { %v1060_v1 = vpop.permute.xlu2 %1059 }
0x11ae   :  { %v1062_v53 = vmul.f32 %v1060_v1, %v1057_v14 }
0x11b0   :  { %v1066_v11 = vadd.f32 %v1065_v3, %v1062_v53 }
0x11b2   :  { %1068 = vrot.lane.b32.xlu1 %v1066_v11, %s1382_s2  ;;  %v998_v15 = vpop.permute.xlu0 %997 }
0x11b3   :  { %v1000_v18 = vmul.f32 %v998_v15, %v995_v17 }
0x11b5   :  { %v1002_v22 = vadd.f32 %v1001_v21, %v1000_v18 }
0x11b7   :  { %v1072_v39 = vrot.slane %v1002_v22, 2 }
0x1224   :  { %v1069_v23 = vpop.permute.xlu1 %1068 }
0x1225   :  { %v1074_v24 = vsel %vm96_vm4, %v1069_v23, %v1072_v39 }
0x1226   :  { %v1075_v25 = vpack.c.bf16 %v1074_v24, %v1074_v24 }
0x1228   :  { %v1077_v26 = vrot.slane %v1075_v25, 3 }
0x122a   :  { %1212 = vmatmul.msk.bf16.vlgmr.msrb.gmra.mxu3 %vm183_vm5, %v1077_v26 }
0x12ad   :  { %v1090_v2 = vpop.f32.mrf.mxu3 }
0x12ae   :  { %v1091_v16 = vadd.f32 %v1090_v2, %v1510_v56 }
0x12b0   :  { %1114 = vrot.lane.b32.xlu2 %v1091_v16, %s1383_s11  ;;  %v1213_v19 = vmul.f32 -1.442695, %v1091_v16 }
0x12b2   :  { %1318 = vpow2.f32 %v1213_v19 }
0x12b5   :  { %v1092_v27 = vpop.f32.mrf.mxu3 }
0x12b8   :  { %v1319_v40 = vpop.eup %1318  ;;  %1134 = vrot.lane.b32.xlu2 %v1132_v4, %s1383_s11 }
0x12b9   :  { %v1097_v20 = vadd.f32 1.0, %v1319_v40 }
0x12bb   :  { %1320 = vrcp.f32 %v1097_v20  ;;  %v1109_v30 = vand.u32 2147483648, %v1097_v20  ;;  %vm1103_vm6 = vweird.f32 %v1097_v20  ;;  %v1107_v31 = vand.u32 2147483647, %v1097_v20 }
0x12bd   :  { %v1110_v56 = vor.u32 1.1754944e-38, %v1109_v30  ;;  %vm1108_vm7 = vcmp.eq.f32.partialorder %v1107_v31, 8.507059e+37 }
0x12c1   :  { %v1321_v6 = vpop.eup %1320 }
0x12c2   :  { %v1099_v41 = vmul.f32 %v1321_v6, %v1097_v20  ;;  %vm1104_vm4 = vweird.f32 %v1321_v6 }
0x12c3   :  { %vm1105_vm5 = vmor %vm1103_vm6, %vm1104_vm4 }
0x12c4   :  { %v1100_v42 = vsub.f32 1.0, %v1099_v41 }
0x12c6   :  { %v1101_v28 = vmul.f32 %v1321_v6, %v1100_v42 }
0x12c8   :  { %v1102_v29 = vadd.f32 %v1321_v6, %v1101_v28 }
0x12ca   :  { %v1106_v32 = vsel %vm1105_vm5, %v1321_v6, %v1102_v29 }
0x12cb   :  { %v1111_v34 = vsel %vm1108_vm7, %v1110_v56, %v1106_v32 }
0x12cc   :  { %v1124_v37 = vsub.f32 1.0, %v1111_v34  ;;  %v1130_v45 = vmul.f32 %v1111_v34, %v1002_v22 }
0x130a   :  { %v1115_v33 = vpop.permute.xlu2 %1114 }
0x130b   :  { %v1117_v5 = vmul.f32 %v1115_v33, %v1111_v34 }
0x130d   :  { %1119 = vrot.lane.b32.xlu0 %v1117_v5, %s1379_s28 }
0x1312   :  { %v1135_v46 = vpop.permute.xlu2 %1134 }
0x137f   :  { %v1120_v12 = vpop.permute.xlu0 %1119 }
0x1380   :  { %v1122_v35 = vadd.f32 %v1120_v12, %v1091_v16 }
0x1382   :  { %1322 = vtanh.f32 %v1122_v35 }
0x1388   :  { %v1323_v36 = vpop.eup %1322 }
0x1389   :  { %1126 = vrot.lane.b32.xlu1 %v1323_v36, %s1382_s2 }
0x13fb   :  { %v1127_v43 = vpop.permute.xlu1 %1126 }
0x13fc   :  { %v1129_v44 = vmul.f32 %v1127_v43, %v1124_v37 }
0x13fe   :  { %v1131_v47 = vadd.f32 %v1130_v45, %v1129_v44 }
0x1400   :  { %v1137_v48 = vmul.f32 %v1135_v46, %v1131_v47 }
0x1402   :  { %1139 = vrot.lane.b32.xlu0 %v1137_v48, %s1382_s2 }
0x1474   :  { %v1140_v49 = vpop.permute.xlu0 %1139 }
0x1475   :  { %v1143_v50 = vsel %vm1142_vm8, %v1140_v49, 0.0 }
0x1476   :  { %1144 = vadd.xlane.f32.xlu1 %v1143_v50 }
0x14e9   :  { %v1145_v51 = vpop.xlane.xlu1 %1144 }
0x14ea   :  { %v1146_v52 = vadd.f32 %v1145_v51, %v1132_v4 }
0x14ec   :  { %1148 = vrot.lane.b32.xlu2 %v1146_v52, %s1382_s2 }
0x1546   :  { %v1149_v54 = vpop.permute.xlu2 %1148 }
0x1547   :  { %1152 = vst.msk [vmem:[%s1710_s5] sm:$0x3] %vm1151_vm9, %v1149_v54 }
0x1548   :  { %1157 = vsyncpa [#allocation3], 1 }
0x1549   :  { %1158 = vsyncpa [#allocation5], 1 }

</bundles_post_ra>
